<compile_context>
chip_gen: v6e
topology: v6e:2x2x1
jax: 0.10.0
libtpu: 0.0.40
codegen_flags: <defaults>
</compile_context>

<pallas_src>
import jax
import jax.numpy as jnp
from jax.experimental import pallas as pl
from jax.experimental.pallas import tpu as pltpu


def _convt_hardclip_kernel(x_ref, w_ref, b_ref, o_ref):
    # x_ref: (1, Cin, tp)   input pixel tile, pixels on the lane axis
    # w_ref: (Kdim, Cin)    Kdim = Cout*kH*kW (= 128), resident every step
    # b_ref: (Kdim, 1)      (bias + 3) pre-folded, broadcast over lanes
    # o_ref: (1, Kdim, tp)
    acc = jnp.dot(w_ref[...], x_ref[0],
                  preferred_element_type=jnp.float32)      # (Kdim, tp) on MXU
    acc = acc + b_ref[...]                                 # conv bias + 3 (folded)
    acc = jnp.minimum(jnp.maximum(acc, 0.0), 6.0)          # clamp_min(0), clamp_max(6)
    # (*6)/6 of the original module is an identity on the clamped value -> dropped
    o_ref[0] = acc.astype(o_ref.dtype)


def conv_transpose_hardclip(x_nchw, weight, bias, *, stride=2, padding=0, tp=2048):
    """x_nchw: (N, Cin, H, W) f32
       weight: (Cin, Cout, kH, kW) f32  (PyTorch ConvTranspose2d layout)
       bias:   (Cout,) f32
       Valid only for stride == kernel_size and padding == 0 (as in the module).
       Returns (N, Cout, H*kH, W*kW) f32, matching the PyTorch module."""
    N, Cin, H, W = x_nchw.shape
    Cin_w, Cout, kH, kW = weight.shape
    assert Cin == Cin_w
    if padding != 0 or stride != kH or stride != kW:
        raise NotImplementedError(
            "per-pixel-matmul mapping requires stride == kernel_size, padding == 0")

    Kdim = Cout * kH * kW
    P = H * W

    # --- zero-cost / tiny wrapper prep ---
    x_p = x_nchw.reshape(N, Cin, P)                            # metadata-only reshape
    w_t = jnp.transpose(weight.reshape(Cin, Kdim))             # (Kdim, Cin), 8 KiB one-off
    b3 = (jnp.repeat(bias, kH * kW) + 3.0).reshape(Kdim, 1)    # bias with +3 folded in

    # --- pixel tiling: large lane-dense tiles, ragged tail handled by Pallas ---
    if P <= tp:
        tp = P                                  # full-extent block is always legal
    else:
        tp = max(128, (tp // 128) * 128)        # keep the lane axis 128-aligned
    n_p = pl.cdiv(P, tp)

    cost = pl.CostEstimate(
        flops=2 * N * P * Cin * Kdim,
        transcendentals=0,
        bytes_accessed=4 * (N * P * Cin + Kdim * Cin + Kdim + N * P * Kdim),
    )

    y = pl.pallas_call(
        _convt_hardclip_kernel,
        out_shape=jax.ShapeDtypeStruct((N, Kdim, P), jnp.float32),
        grid_spec=pltpu.PrefetchScalarGridSpec(
            num_scalar_prefetch=0,
            grid=(N, n_p),
            in_specs=[
                pl.BlockSpec((1, Cin, tp), lambda n, p: (n, 0, p)),
                pl.BlockSpec((Kdim, Cin), lambda n, p: (0, 0)),
                pl.BlockSpec((Kdim, 1), lambda n, p: (0, 0)),
            ],
            out_specs=pl.BlockSpec((1, Kdim, tp), lambda n, p: (n, 0, p)),
        ),
        compiler_params=pltpu.CompilerParams(
            dimension_semantics=("parallel", "parallel")),
        cost_estimate=cost,
    )(x_p, w_t, b3)

    # --- depth-to-space back to PyTorch NCHW ---
    # TODO(synk): this single remaining XLA pass could be skipped entirely if
    # downstream accepts the (N, Cout, kH, kW, H, W) expanded-channel layout.
    y = y.reshape(N, Cout, kH, kW, H, W)
    y = jnp.transpose(y, (0, 1, 4, 2, 5, 3))                   # N, Cout, H, kH, W, kW
    return y.reshape(N, Cout, H * kH, W * kW)


def _reference(x_nchw, weight, bias):
    # Pure-JAX reference that mirrors the PyTorch module op-for-op.
    N, Cin, H, W = x_nchw.shape
    _, Cout, kH, kW = weight.shape
    y = jnp.einsum("nchw,cokl->nohkwl", x_nchw, weight)
    y = y.reshape(N, Cout, H * kH, W * kW) + bias[None, :, None, None]
    y = y + 3.0
    y = jnp.clip(y, 0.0, 6.0)
    y = y * 6.0
    y = y / 6.0
    return y


if __name__ == "__main__":
    key = jax.random.PRNGKey(0)
    k_x, k_w, k_b = jax.random.split(key, 3)

    # Shapes implied by the module: Cin=16 -> Cout=32, k=2, s=2, input 128x128.
    N, Cin, H, W = 1, 16, 128, 128
    Cout, kH, kW = 32, 2, 2

    x = jax.random.normal(k_x, (N, Cin, H, W), dtype=jnp.float32)
    bound = 1.0 / (Cin * kH * kW) ** 0.5
    weight = jax.random.uniform(k_w, (Cin, Cout, kH, kW),
                                minval=-bound, maxval=bound, dtype=jnp.float32)
    bias = jax.random.uniform(k_b, (Cout,),
                              minval=-bound, maxval=bound, dtype=jnp.float32)

    out = conv_transpose_hardclip(x, weight, bias)
    out = jax.block_until_ready(out)

    ref = _reference(x, weight, bias)
    assert out.shape == (N, Cout, H * kH, W * kW)
    assert jnp.allclose(out, ref, atol=1e-4, rtol=1e-5), \
        float(jnp.max(jnp.abs(out - ref)))

    print("KERNEL_OK")
</pallas_src>

<mosaic_0001>
module attributes {stable_mosaic.version = 11 : i64} {
  func.func @_convt_hardclip_kernel(%arg0: i32, %arg1: i32, %arg2: memref<1x16x2048xf32, #tpu.memory_space<vmem>>, %arg3: memref<128x16xf32, #tpu.memory_space<vmem>>, %arg4: memref<128x1xf32, #tpu.memory_space<vmem>>, %arg5: memref<1x128x2048xf32, #tpu.memory_space<vmem>>) attributes {dimension_semantics = [#tpu.dimension_semantics<parallel>, #tpu.dimension_semantics<parallel>], iteration_bounds = array<i64: 1, 8>, scalar_prefetch = 0 : i64, scratch_operands = 0 : i64, tpu.core_type = #tpu.core_type<tc>, window_params = [{transform_indices = @transform_0, window_bounds = array<i64: 1, 16, 2048>}, {pipeline_mode = #tpu.pipeline_mode<synchronous>, transform_indices = @transform_1, window_bounds = array<i64: 128, 16>}, {pipeline_mode = #tpu.pipeline_mode<synchronous>, transform_indices = @transform_2, window_bounds = array<i64: 128, 1>}, {transform_indices = @transform_3, window_bounds = array<i64: 1, 128, 2048>}]} {
    %c0 = arith.constant 0 : index
    %c0_0 = arith.constant 0 : index
    %0 = vector.load %arg3[%c0, %c0_0] : memref<128x16xf32, #tpu.memory_space<vmem>>, vector<128x16xf32>
    %c0_1 = arith.constant 0 : index
    %c0_2 = arith.constant 0 : index
    %c0_3 = arith.constant 0 : index
    %1 = vector.load %arg2[%c0_1, %c0_2, %c0_3] : memref<1x16x2048xf32, #tpu.memory_space<vmem>>, vector<1x16x2048xf32>
    %2 = vector.shape_cast %1 : vector<1x16x2048xf32> to vector<16x2048xf32>
    %cst = arith.constant dense<0.000000e+00> : vector<128x2048xf32>
    %3 = tpu.matmul %0, %2, %cst {dimension_numbers = #tpu.dot_dimension_numbers<[1], [0], [0], [1], [0, 0, 1, 1], [], []>} : vector<128x16xf32>, vector<16x2048xf32>, vector<128x2048xf32> -> vector<128x2048xf32>
    %c0_4 = arith.constant 0 : index
    %c0_5 = arith.constant 0 : index
    %4 = vector.load %arg4[%c0_4, %c0_5] : memref<128x1xf32, #tpu.memory_space<vmem>>, vector<128x1xf32>
    %5 = vector.broadcast %4 : vector<128x1xf32> to vector<128x2048xf32>
    %6 = arith.addf %3, %5 : vector<128x2048xf32>
    %cst_6 = arith.constant 0.000000e+00 : f32
    %7 = vector.broadcast %cst_6 : f32 to vector<128x2048xf32>
    %8 = arith.maximumf %6, %7 : vector<128x2048xf32>
    %cst_7 = arith.constant 6.000000e+00 : f32
    %9 = vector.broadcast %cst_7 : f32 to vector<128x2048xf32>
    %10 = arith.minimumf %8, %9 : vector<128x2048xf32>
    %c0_8 = arith.constant 0 : index
    %c0_9 = arith.constant 0 : index
    %c0_10 = arith.constant 0 : index
    %11 = vector.load %arg5[%c0_8, %c0_9, %c0_10] : memref<1x128x2048xf32, #tpu.memory_space<vmem>>, vector<1x128x2048xf32>
    %12 = vector.shape_cast %11 : vector<1x128x2048xf32> to vector<128x2048xf32>
    %13 = vector.shape_cast %10 : vector<128x2048xf32> to vector<1x128x2048xf32>
    tpu.vector_store %arg5[%c0_8, %c0_9, %c0_10], %13 {strides = array<i32>} : memref<1x128x2048xf32, #tpu.memory_space<vmem>>, vector<1x128x2048xf32>,
    return
  }
  func.func @transform_0(%arg0: i32, %arg1: i32) -> (i32, i32, i32) {
    %c0_i32 = arith.constant 0 : i32
    %c0_i32_0 = arith.constant 0 : i32
    return %arg0, %c0_i32, %arg1 : i32, i32, i32
  }
  func.func @transform_1(%arg0: i32, %arg1: i32) -> (i32, i32) {
    %c0_i32 = arith.constant 0 : i32
    %c0_i32_0 = arith.constant 0 : i32
    %c0_i32_1 = arith.constant 0 : i32
    return %c0_i32, %c0_i32_0 : i32, i32
  }
  func.func @transform_2(%arg0: i32, %arg1: i32) -> (i32, i32) {
    %c0_i32 = arith.constant 0 : i32
    %c0_i32_0 = arith.constant 0 : i32
    %c0_i32_1 = arith.constant 0 : i32
    return %c0_i32, %c0_i32_0 : i32, i32
  }
  func.func @transform_3(%arg0: i32, %arg1: i32) -> (i32, i32, i32) {
    %c0_i32 = arith.constant 0 : i32
    %c0_i32_0 = arith.constant 0 : i32
    return %arg0, %c0_i32, %arg1 : i32, i32, i32
  }
}

</mosaic_0001>

<bundles_post_ra>
// kernel: tpu_custom_call.1
= control target key start
LH: loop header
LB: loop body
LE: loop exit
PB: predicated region body
PF: predicated region fallthrough
CT: control target
= control target key end

     0   :  { %8 = vsyncpa [#allocation3], 0  ;;  %s4156_s0 = inlined_call_operand.hbm [shape: f32[1,16,16384], index: 0, kind: input, shape index: {}]   ;;  %s4157_s1 = inlined_call_operand.vmem [shape: f32[128,16], index: 1, kind: input, shape index: {}]   ;;  %s4158_s2 = inlined_call_operand.vmem [shape: f32[128,1], index: 2, kind: input, shape index: {}]   ;;  %s4159_s3 = inlined_call_operand.hbm [shape: f32[1,128,16384], index: 3, kind: output, shape index: {}]  }
   0x1   :  { %10 = vsyncpa [#allocation3 + $0x1], 0 }
   0x2   :  { %11 = vsyncpa [#allocation4], 0 }
   0x3   :  { %13 = vsyncpa [#allocation4 + $0x1], 0  ;;  %s2919_s12 = smov 0   ;;  %s2921_s13 = smov 0  }
   0x4   :  { %s2923_s14 = smov 0   ;;  %s2925_s15 = smov 0  }
   0x5   :  { %s2927_s16 = smov 0   ;;  %s2929_s17 = smov 0  }
   0x6 LB: > { %s2561_s18 = sadd.s32 4294967295, %s2887_s17   ;;  %s2562_s19 = sadd.s32 4294967294, %s2887_s17   ;;  %s2887_s17 = sphi %s2929_s17, %s19_s17   ;;  %s2883_s16 = sphi %s2927_s16, %s4169_s16   ;;  %s2879_s15 = sphi %s2925_s15, %s4168_s15   ;;  %s2875_s14 = sphi %s2923_s14, %s4167_s14   ;;  %s2871_s13 = sphi %s2921_s13, %s4166_s13   ;;  %s2867_s12 = sphi %s2919_s12, %s4165_s12  }
   0x7   : > { %s28_s20 = sadd.s32 1, %s2883_s16  ;;  %s40_s21 = sadd.s32 1, %s2875_s14 }
   0x8   : > { %p29_p0 = scmp.ge.s32.totalorder %s28_s20, 8  ;;  %p47_p1 = scmp.ne.s32.totalorder %s2875_s14, %s2871_s13 }
   0x9   : > { %p48_p2 = scmp.eq.s32.totalorder %s2887_s17, 0  ;;  %p53_p3 = scmp.ne.s32.totalorder %s2871_s13, %s2867_s12 }
   0xa   : > { %s4171_s20 = smov (%p29_p0, %s28_s20), 0  ;;  %p54_p5 = scmp.eq.s32.totalorder %s2561_s18, 0 }
   0xb   : > { %p2960_p4 = por %p48_p2, %p47_p1  ;;  %s36_s23 = ssub.s32 %s2883_s16, %s4171_s20 }
   0xc   : > { %p121_p6 = scmp.eq.s32.totalorder %s2561_s18, 7  ;;  %p38_p7 = scmp.eq.s32.totalorder %s36_s23, 0 }
   0xd   : > { %p2966_p8 = por %p54_p5, %p53_p3  ;;  %p127_p10 = scmp.eq.s32.totalorder %s2562_s19, 7 }
   0xe   : > { %p2970_p9 = por %p121_p6, %p47_p1  ;;  %p2718_p12 = scmp.lt.s32.totalorder %s2887_s17, 8 }
   0xf   : > { %s2975_s26 = scalar_select %p38_p7, %s2875_s14, %s40_s21  }
  0x10   : > { %p2977_p11 = por %p127_p10, %p53_p3  ;;  %s153_s28 = sand.u32 1, %s2875_s14  }
  0x11   : > { %s2565_s29 = sshll.u32 %s153_s28, 8  ;;  %s2704_s30 = sshll.u32 %s2883_s16, 11 }
  0x12   : > { %s165_s6 = scalar_lea.hbm %s4156_s0, %s2704_s30  ;;  %s157_s7 = scalar_lea.vmem [#allocation2], %s2565_s29 }
  0x13   : > { %s166_s8 = sshll.u32 %s157_s7, 4  ;;  %p2989_p13 = pnand %p2718_p12, %p2960_p4  ;;  %s167_s8 = int_to_ptr.vmem [resolvable:$true] %s166_s8 }
  0x14   : > { %s154_s10 = scalar_lea.sflag [#allocation3], %s153_s28  ;;  %s2792_s11 = scalar_lea.vmem %s167_s8, 4096 }
  0x15   : > { %p2781_p0 = pneg %p2989_p13  ;;  %p2793_p1 = scmp.ne.s32.totalorder %s167_s8, %s2792_s11 }
  0x16   : > { %s2889_s18 = smov [#allocation2]  }
  0x17   : > { %p2795_p2 = pnand %p2793_p1, %p2781_p0  ;;  %s2797_s19 = sshll.u32 %s2889_s18, 4  ;;  %s2798_s19 = int_to_ptr.vmem [resolvable:$false] %s2797_s19 }
  0x18   : > { %s2799_s21 = scalar_lea.vmem %s2798_s19, 8192  ;;  %p2800_p5 = scmp.lt.s32.totalorder %s167_s8, %s2798_s19 }
  0x19   : > { %p2796_p3 = pneg %p2795_p2  ;;  %p2801_p6 = scmp.lt.s32.totalorder %s2799_s21, %s2792_s11 }
  0x1b   : > { %p2802_p7 = por %p2801_p6, %p2800_p5 }
  0x1d   : > { %p2803_p10 = pnand %p2802_p7, %p2796_p3 }
  0x1f   : > { %2806 = shalt.err (!%p2803_p10)
}
  0x20   : > { %s2890_s22 = smov 16384   ;;  %s2891_s23 = smov 2048  }
  0x21   : > { %s2892_s28 = smov 128   ;;  %p2568_p4 = scmp.ge.s32.totalorder %s2887_s17, 1 }
  0x22   : > { %2713 = dma.hbm_to_vmem [thread:$0]  (!%p2989_p13), %s165_s6, 4096, %s167_s8, %s154_s10, %s2890_s22, %s2891_s23, %s2892_s28  }
  0x23   : > { %p174_p12 = scmp.lt.s32.totalorder %s2887_s17, 9 }
  0x25   : > { %p175_p0 = pnand %p2568_p4, %p174_p12 }
  0x26   : > { %s3000_s29 = sand.u32 (!%p175_p0), 1, %s2871_s13  }
  0x27   : > { %178 = sbr.rel (%p175_p0) target bundleno = 520 (0x208), region = 32  ;;  %s2569_s30 = sshll.u32 (!%p175_p0), %s3000_s29, 8 }
  0x28   : > { %s181_s4 = scalar_lea.sflag (!%p175_p0), [#allocation3], %s3000_s29  ;;  %s3004_s5 = scalar_lea.vmem (!%p175_p0), [#allocation2], %s2569_s30 }
  0x2c   : > { %2858 = dma.done.wait (%p2966_p8), %s181_s4, 4096  }
  0x2d   : > { %2860 = vsyncadd (%p2966_p8), %s181_s4, 4294963200  ;;  %v2893_v0 = vmov 0.0   ;;  %v2894_v1 = vmov 0   ;;  %v242_v2 = vld [vmem:[%s3004_s5 + $0x88] sm:$0xff]  ;;  %v244_v3 = vld [vmem:[%s3004_s5 + $0x98] sm:$0xff]  ;;  %vm353_vm0 = vcmask 130048  }
  0x2e   : > { %466 = vmatprep.mubr.f32.mxu0 %v2893_v0  ;;  %627 = vmatprep.mubr.f32.mxu1 %v2893_v0  ;;  %v241_v4 = vld [vmem:[%s3004_s5 + $0x80] sm:$0xff]  ;;  %v243_v5 = vld [vmem:[%s3004_s5 + $0x90] sm:$0xff]  ;;  %v226_v6 = vld [vmem:[%s3004_s5 + $0x8] sm:$0xff]  ;;  %s2705_s18 = sshll.u32 %s2879_s15, 11  ;;  %s2459_s23 = scalar_lea.sflag [#allocation4], %s3000_s29 }
  0x2f   : > { %2776 = vset.pattern.permute.xlu0 %v2894_v1  ;;  %2777 = vset.pattern.permute.xlu1 %v2894_v1  ;;  %v228_v7 = vld [vmem:[%s3004_s5 + $0x18] sm:$0xff]  ;;  %v225_v8 = vld [vmem:[%s3004_s5] sm:$0xff]  ;;  %v227_v9 = vld [vmem:[%s3004_s5 + $0x10] sm:$0xff]  ;;  %s4101_s22 = scalar_lea.hbm %s4159_s3, %s2705_s18  ;;  %s2895_s30 = smov [#allocation5]  }
  0x30   : > { %430 = vmatprep.subr.mxu0 %v242_v2  ;;  %591 = vmatprep.subr.mxu1 %v244_v3  ;;  %v3023_v10 = vld [vmem:[%s4157_s1] sm:$0xff]  ;;  %v246_v11 = vld [vmem:[%s3004_s5 + $0xa8] sm:$0xff]  ;;  %v248_v12 = vld [vmem:[%s3004_s5 + $0xb8] sm:$0xff]  ;;  %s2811_s4 = sshll.u32 %s2895_s30, 4  ;;  %s2812_s4 = int_to_ptr.vmem [resolvable:$false] %s2811_s4 }
  0x31   : > { %431 = vmatpush1.msra.mxu0 %v241_v4  ;;  %592 = vmatpush1.msra.mxu1 %v243_v5  ;;  %v245_v13 = vld [vmem:[%s3004_s5 + $0xa0] sm:$0xff]  ;;  %v247_v14 = vld [vmem:[%s3004_s5 + $0xb0] sm:$0xff]  ;;  %v3036_v15 = vld [vmem:[%s4157_s1 + $0x8] sm:$0xff]  ;;  %s2813_s24 = scalar_lea.vmem %s2812_s4, 65536 }
  0x32   : > { %432 = vmatprep.subr.mxu0 %v226_v6  ;;  %593 = vmatprep.subr.mxu1 %v228_v7  ;;  %v230_v16 = vld [vmem:[%s3004_s5 + $0x28] sm:$0xff]  ;;  %v232_v17 = vld [vmem:[%s3004_s5 + $0x38] sm:$0xff]  ;;  %v229_v18 = vld [vmem:[%s3004_s5 + $0x20] sm:$0xff] }
  0x33   : > { %433 = vmatpush1.msra.mxu0 %v225_v8  ;;  %594 = vmatpush1.msra.mxu1 %v227_v9  ;;  %v231_v19 = vld [vmem:[%s3004_s5 + $0x30] sm:$0xff]  ;;  %v250_v21 = vld [vmem:[%s3004_s5 + $0xc8] sm:$0xff]  ;;  %v252_v22 = vld [vmem:[%s3004_s5 + $0xd8] sm:$0xff] }
  0x34   : > { %2571 = vmatmul.mubr.msk.f32.vlgmr.msra.gmra.mxu0 %vm353_vm0, %v3023_v10  ;;  %2587 = vmatmul.mubr.msk.f32.vlgmr.msra.gmra.mxu1 %vm353_vm0, %v3023_v10  ;;  %v3053_v20 = vld [vmem:[%s4157_s1 + $0x10] sm:$0xff]  ;;  %v257_v23 = vld [vmem:[%s4158_s2] sm:$0xff]  ;;  %v3072_v25 = vld [vmem:[%s4157_s1 + $0x18] sm:$0xff] }
  0x35   : > { %752 = vmatprep.subr.mxu0 %v246_v11  ;;  %913 = vmatprep.subr.mxu1 %v248_v12  ;;  %v259_v24 = vld [vmem:[%s4158_s2 + $0x10] sm:$0xff]  ;;  %v258_v26 = vld [vmem:[%s4158_s2 + $0x8] sm:$0xff]  ;;  %v260_v27 = vld [vmem:[%s4158_s2 + $0x18] sm:$0xff] }
  0x36   : > { %753 = vmatpush1.msra.mxu0 %v245_v13  ;;  %914 = vmatpush1.msra.mxu1 %v247_v14  ;;  %v3089_v28 = vld [vmem:[%s4157_s1 + $0x20] sm:$0xff]  ;;  %v262_v30 = vld [vmem:[%s4158_s2 + $0x28] sm:$0xff]  ;;  %v263_v32 = vld [vmem:[%s4158_s2 + $0x30] sm:$0xff] }
  0x37   : > { %472 = vmatprep.mubr.f32.mxu0 %v2893_v0  ;;  %633 = vmatprep.mubr.f32.mxu1 %v2893_v0  ;;  %v261_v29 = vld [vmem:[%s4158_s2 + $0x20] sm:$0xff]  ;;  %v3106_v31 = vld [vmem:[%s4157_s1 + $0x28] sm:$0xff]  ;;  %v264_v33 = vld [vmem:[%s4158_s2 + $0x38] sm:$0xff] }
  0x38   : > { %2572 = vmatmul.mubr.msk.f32.gmra.mxu0 %vm353_vm0, %v3036_v15  ;;  %2588 = vmatmul.mubr.msk.f32.gmra.mxu1 %vm353_vm0, %v3036_v15  ;;  %v3123_v34 = vld [vmem:[%s4157_s1 + $0x30] sm:$0xff]  ;;  %v265_v35 = vld [vmem:[%s4158_s2 + $0x40] sm:$0xff]  ;;  %v266_v36 = vld [vmem:[%s4158_s2 + $0x48] sm:$0xff] }
  0x39   : > { %478 = vmatprep.mubr.f32.mxu0 %v2893_v0  ;;  %639 = vmatprep.mubr.f32.mxu1 %v2893_v0  ;;  %v3140_v37 = vld [vmem:[%s4157_s1 + $0x38] sm:$0xff]  ;;  %v267_v38 = vld [vmem:[%s4158_s2 + $0x50] sm:$0xff]  ;;  %v3157_v40 = vld [vmem:[%s4157_s1 + $0x40] sm:$0xff] }
  0x3a   : > { %754 = vmatprep.subr.mxu0 %v230_v16  ;;  %915 = vmatprep.subr.mxu1 %v232_v17  ;;  %v268_v39 = vld [vmem:[%s4158_s2 + $0x58] sm:$0xff]  ;;  %v269_v41 = vld [vmem:[%s4158_s2 + $0x60] sm:$0xff]  ;;  %v270_v42 = vld [vmem:[%s4158_s2 + $0x68] sm:$0xff] }
  0x3b   : > { %755 = vmatpush1.msra.mxu0 %v229_v18  ;;  %916 = vmatpush1.msra.mxu1 %v231_v19  ;;  %v3174_v43 = vld [vmem:[%s4157_s1 + $0x48] sm:$0xff]  ;;  %v271_v44 = vld [vmem:[%s4158_s2 + $0x70] sm:$0xff]  ;;  %v272_v45 = vld [vmem:[%s4158_s2 + $0x78] sm:$0xff] }
  0x3c   : > { %2573 = vmatmul.mubr.msk.f32.gmra.mxu0 %vm353_vm0, %v3053_v20  ;;  %2589 = vmatmul.mubr.msk.f32.gmra.mxu1 %vm353_vm0, %v3053_v20  ;;  %v3191_v46 = vld [vmem:[%s4157_s1 + $0x50] sm:$0xff]  ;;  %v3202_v47 = vld [vmem:[%s4157_s1 + $0x58] sm:$0xff]  ;;  %v3213_v48 = vld [vmem:[%s4157_s1 + $0x60] sm:$0xff] }
  0x3d   : > { %484 = vmatprep.mubr.f32.mxu0 %v2893_v0  ;;  %645 = vmatprep.mubr.f32.mxu1 %v2893_v0  ;;  %v3224_v49 = vld [vmem:[%s4157_s1 + $0x68] sm:$0xff]  ;;  %v3235_v50 = vld [vmem:[%s4157_s1 + $0x70] sm:$0xff]  ;;  %v3246_v51 = vld [vmem:[%s4157_s1 + $0x78] sm:$0xff] }
  0x3e   : > { %1074 = vmatprep.subr.mxu0 %v250_v21  ;;  %1235 = vmatprep.subr.mxu1 %v252_v22  ;;  %v249_v52 = vld [vmem:[%s3004_s5 + $0xc0] sm:$0xff]  ;;  %v251_v53 = vld [vmem:[%s3004_s5 + $0xd0] sm:$0xff]  ;;  %v234_v54 = vld [vmem:[%s3004_s5 + $0x48] sm:$0xff] }
  0x3f   : > { %275 = vperm.xlu0 %2776, %v257_v23   ;;  %285 = vperm.xlu1 %2777, %v259_v24   ;;  %v236_v55 = vld [vmem:[%s3004_s5 + $0x58] sm:$0xff]  ;;  %v233_v56 = vld [vmem:[%s3004_s5 + $0x40] sm:$0xff]  ;;  %v235_v57 = vld [vmem:[%s3004_s5 + $0x50] sm:$0xff] }
  0x40   : > { %2574 = vmatmul.mubr.msk.f32.gmra.mxu0 %vm353_vm0, %v3072_v25  ;;  %2590 = vmatmul.mubr.msk.f32.gmra.mxu1 %vm353_vm0, %v3072_v25  ;;  %v254_v58 = vld [vmem:[%s3004_s5 + $0xe8] sm:$0xff]  ;;  %v256_v59 = vld [vmem:[%s3004_s5 + $0xf8] sm:$0xff]  ;;  %v253_v60 = vld [vmem:[%s3004_s5 + $0xe0] sm:$0xff] }
  0x41   : > { %490 = vmatprep.mubr.f32.mxu0 %v2893_v0  ;;  %651 = vmatprep.mubr.f32.mxu1 %v2893_v0  ;;  %v255_v61 = vld [vmem:[%s3004_s5 + $0xf0] sm:$0xff]  ;;  %v238_v62 = vld [vmem:[%s3004_s5 + $0x68] sm:$0xff]  ;;  %v240_v63 = vld [vmem:[%s3004_s5 + $0x78] sm:$0xff] }
  0x42   : > { %v237_v1 = vld [vmem:[%s3004_s5 + $0x60] sm:$0xff]  ;;  %v239_v2 = vld [vmem:[%s3004_s5 + $0x70] sm:$0xff]  ;;  %s2570_s5 = sshll.u32 %s3000_s29, 11 }
  0x43   : > { %280 = vperm.xlu0 %2776, %v258_v26   ;;  %290 = vperm.xlu1 %2777, %v260_v27   ;;  %s3485_s9 = scalar_lea.vmem [#allocation5], %s2570_s5 }
  0x44   : > { %2575 = vmatmul.mubr.msk.f32.gmra.mxu0 %vm353_vm0, %v3089_v28  ;;  %2591 = vmatmul.mubr.msk.f32.gmra.mxu1 %vm353_vm0, %v3089_v28  ;;  %s2474_s19 = sshll.u32 %s3485_s9, 4  ;;  %s4105_s19 = int_to_ptr.vmem [resolvable:$true] %s2474_s19 }
  0x45   : > { %496 = vmatprep.mubr.f32.mxu0 %v2893_v0  ;;  %657 = vmatprep.mubr.f32.mxu1 %v2893_v0  ;;  %s2807_s28 = scalar_lea.vmem %s4105_s19, 32768  ;;  %p2814_p2 = scmp.lt.s32.totalorder %s4105_s19, %s2812_s4 }
  0x46   : > { %p2808_p8 = scmp.ne.s32.totalorder %s4105_s19, %s2807_s28  ;;  %p2815_p3 = scmp.lt.s32.totalorder %s2813_s24, %s2807_s28 }
  0x47   : > { %295 = vperm.xlu0 %2776, %v261_v29   ;;  %300 = vperm.xlu1 %2777, %v262_v30  }
  0x48   : > { %2576 = vmatmul.mubr.msk.f32.gmra.mxu0 %vm353_vm0, %v3106_v31  ;;  %2592 = vmatmul.mubr.msk.f32.gmra.mxu1 %vm353_vm0, %v3106_v31  ;;  %p2809_p13 = pnand %p2808_p8, %p2970_p9  ;;  %p2816_p5 = por %p2815_p3, %p2814_p2 }
  0x49   : > { %502 = vmatprep.mubr.f32.mxu0 %v2893_v0  ;;  %663 = vmatprep.mubr.f32.mxu1 %v2893_v0 }
  0x4a   : > { %p2810_p1 = pneg %p2809_p13 }
  0x4b   : > { %305 = vperm.xlu0 %2776, %v263_v32   ;;  %310 = vperm.xlu1 %2777, %v264_v33  }
  0x4c   : > { %2577 = vmatmul.mubr.msk.f32.gmra.mxu0 %vm353_vm0, %v3123_v34  ;;  %2593 = vmatmul.mubr.msk.f32.gmra.mxu1 %vm353_vm0, %v3123_v34  ;;  %p2817_p6 = pnand %p2816_p5, %p2810_p1 }
  0x4d   : > { %508 = vmatprep.mubr.f32.mxu0 %v2893_v0  ;;  %669 = vmatprep.mubr.f32.mxu1 %v2893_v0 }
  0x4f   : > { %315 = vperm.xlu0 %2776, %v265_v35   ;;  %320 = vperm.xlu1 %2777, %v266_v36  }
  0x50   : > { %2578 = vmatmul.mubr.msk.f32.gmra.mxu0 %vm353_vm0, %v3140_v37  ;;  %2594 = vmatmul.mubr.msk.f32.gmra.mxu1 %vm353_vm0, %v3140_v37 }
  0x51   : > { %514 = vmatprep.mubr.f32.mxu0 %v2893_v0  ;;  %675 = vmatprep.mubr.f32.mxu1 %v2893_v0 }
  0x53   : > { %325 = vperm.xlu0 %2776, %v267_v38   ;;  %330 = vperm.xlu1 %2777, %v268_v39  }
  0x54   : > { %2579 = vmatmul.mubr.msk.f32.gmra.mxu0 %vm353_vm0, %v3157_v40  ;;  %2595 = vmatmul.mubr.msk.f32.gmra.mxu1 %vm353_vm0, %v3157_v40 }
  0x55   : > { %520 = vmatprep.mubr.f32.mxu0 %v2893_v0  ;;  %681 = vmatprep.mubr.f32.mxu1 %v2893_v0 }
  0x57   : > { %335 = vperm.xlu0 %2776, %v269_v41   ;;  %340 = vperm.xlu1 %2777, %v270_v42  }
  0x58   : > { %2580 = vmatmul.mubr.msk.f32.gmra.mxu0 %vm353_vm0, %v3174_v43  ;;  %2596 = vmatmul.mubr.msk.f32.gmra.mxu1 %vm353_vm0, %v3174_v43 }
  0x59   : > { %526 = vmatprep.mubr.f32.mxu0 %v2893_v0  ;;  %687 = vmatprep.mubr.f32.mxu1 %v2893_v0 }
  0x5b   : > { %345 = vperm.xlu0 %2776, %v271_v44   ;;  %350 = vperm.xlu1 %2777, %v272_v45  }
  0x5c   : > { %2581 = vmatmul.mubr.msk.f32.gmra.mxu0 %vm353_vm0, %v3191_v46  ;;  %2597 = vmatmul.mubr.msk.f32.gmra.mxu1 %vm353_vm0, %v3191_v46 }
  0x5d   : > { %532 = vmatprep.mubr.f32.mxu0 %v2893_v0  ;;  %693 = vmatprep.mubr.f32.mxu1 %v2893_v0 }
  0x60   : > { %2582 = vmatmul.mubr.msk.f32.gmra.mxu0 %vm353_vm0, %v3202_v47  ;;  %2598 = vmatmul.mubr.msk.f32.gmra.mxu1 %vm353_vm0, %v3202_v47 }
  0x61   : > { %538 = vmatprep.mubr.f32.mxu0 %v2893_v0  ;;  %699 = vmatprep.mubr.f32.mxu1 %v2893_v0 }
  0x64   : > { %2583 = vmatmul.mubr.msk.f32.gmra.mxu0 %vm353_vm0, %v3213_v48  ;;  %2599 = vmatmul.mubr.msk.f32.gmra.mxu1 %vm353_vm0, %v3213_v48 }
  0x65   : > { %544 = vmatprep.mubr.f32.mxu0 %v2893_v0  ;;  %705 = vmatprep.mubr.f32.mxu1 %v2893_v0 }
  0x68   : > { %2584 = vmatmul.mubr.msk.f32.gmra.mxu0 %vm353_vm0, %v3224_v49  ;;  %2600 = vmatmul.mubr.msk.f32.gmra.mxu1 %vm353_vm0, %v3224_v49 }
  0x69   : > { %550 = vmatprep.mubr.f32.mxu0 %v2893_v0  ;;  %711 = vmatprep.mubr.f32.mxu1 %v2893_v0 }
  0x6c   : > { %2585 = vmatmul.mubr.msk.f32.gmra.mxu0 %vm353_vm0, %v3235_v50  ;;  %2601 = vmatmul.mubr.msk.f32.gmra.mxu1 %vm353_vm0, %v3235_v50 }
  0x6d   : > { %556 = vmatprep.mubr.f32.mxu0 %v2893_v0  ;;  %717 = vmatprep.mubr.f32.mxu1 %v2893_v0 }
  0x70   : > { %2586 = vmatmul.mubr.msk.f32.gmra.mxu0 %vm353_vm0, %v3246_v51  ;;  %2602 = vmatmul.mubr.msk.f32.gmra.mxu1 %vm353_vm0, %v3246_v51 }
  0x71   : > { %788 = vmatprep.mubr.f32.mxu0 %v2893_v0  ;;  %949 = vmatprep.mubr.f32.mxu1 %v2893_v0 }
  0x74   : > { %2603 = vmatmul.mubr.msk.f32.vlgmr.msra.gmra.mxu0 %vm353_vm0, %v3023_v10  ;;  %2619 = vmatmul.mubr.msk.f32.vlgmr.msra.gmra.mxu1 %vm353_vm0, %v3023_v10 }
  0x75   : > { %1075 = vmatpush1.msra.mxu0 %v249_v52  ;;  %1236 = vmatpush1.msra.mxu1 %v251_v53 }
  0x76   : > { %794 = vmatprep.mubr.f32.mxu0 %v2893_v0  ;;  %955 = vmatprep.mubr.f32.mxu1 %v2893_v0 }
  0x77   : > { %1076 = vmatprep.subr.mxu0 %v234_v54  ;;  %1237 = vmatprep.subr.mxu1 %v236_v55 }
  0x78   : > { %2604 = vmatmul.mubr.msk.f32.gmra.mxu0 %vm353_vm0, %v3036_v15  ;;  %2620 = vmatmul.mubr.msk.f32.gmra.mxu1 %vm353_vm0, %v3036_v15 }
  0x79   : > { %800 = vmatprep.mubr.f32.mxu0 %v2893_v0  ;;  %961 = vmatprep.mubr.f32.mxu1 %v2893_v0 }
  0x7a   : > { %1077 = vmatpush1.msra.mxu0 %v233_v56  ;;  %1238 = vmatpush1.msra.mxu1 %v235_v57 }
  0x7b   : > { %1396 = vmatprep.subr.mxu0 %v254_v58  ;;  %1557 = vmatprep.subr.mxu1 %v256_v59 }
  0x7c   : > { %2605 = vmatmul.mubr.msk.f32.gmra.mxu0 %vm353_vm0, %v3053_v20  ;;  %2621 = vmatmul.mubr.msk.f32.gmra.mxu1 %vm353_vm0, %v3053_v20 }
  0x7d   : > { %806 = vmatprep.mubr.f32.mxu0 %v2893_v0  ;;  %967 = vmatprep.mubr.f32.mxu1 %v2893_v0 }
  0x80   : > { %2606 = vmatmul.mubr.msk.f32.gmra.mxu0 %vm353_vm0, %v3072_v25  ;;  %2622 = vmatmul.mubr.msk.f32.gmra.mxu1 %vm353_vm0, %v3072_v25 }
  0x81   : > { %812 = vmatprep.mubr.f32.mxu0 %v2893_v0  ;;  %973 = vmatprep.mubr.f32.mxu1 %v2893_v0 }
  0x84   : > { %2607 = vmatmul.mubr.msk.f32.gmra.mxu0 %vm353_vm0, %v3089_v28  ;;  %2623 = vmatmul.mubr.msk.f32.gmra.mxu1 %vm353_vm0, %v3089_v28 }
  0x85   : > { %818 = vmatprep.mubr.f32.mxu0 %v2893_v0  ;;  %979 = vmatprep.mubr.f32.mxu1 %v2893_v0 }
  0x88   : > { %2608 = vmatmul.mubr.msk.f32.gmra.mxu0 %vm353_vm0, %v3106_v31  ;;  %2624 = vmatmul.mubr.msk.f32.gmra.mxu1 %vm353_vm0, %v3106_v31 }
  0x89   : > { %824 = vmatprep.mubr.f32.mxu0 %v2893_v0  ;;  %985 = vmatprep.mubr.f32.mxu1 %v2893_v0 }
  0x8c   : > { %2609 = vmatmul.mubr.msk.f32.gmra.mxu0 %vm353_vm0, %v3123_v34  ;;  %2625 = vmatmul.mubr.msk.f32.gmra.mxu1 %vm353_vm0, %v3123_v34 }
  0x8d   : > { %830 = vmatprep.mubr.f32.mxu0 %v2893_v0  ;;  %991 = vmatprep.mubr.f32.mxu1 %v2893_v0 }
  0x90   : > { %2610 = vmatmul.mubr.msk.f32.gmra.mxu0 %vm353_vm0, %v3140_v37  ;;  %2626 = vmatmul.mubr.msk.f32.gmra.mxu1 %vm353_vm0, %v3140_v37 }
  0x91   : > { %836 = vmatprep.mubr.f32.mxu0 %v2893_v0  ;;  %997 = vmatprep.mubr.f32.mxu1 %v2893_v0 }
  0x94   : > { %2611 = vmatmul.mubr.msk.f32.gmra.mxu0 %vm353_vm0, %v3157_v40  ;;  %2627 = vmatmul.mubr.msk.f32.gmra.mxu1 %vm353_vm0, %v3157_v40 }
  0x95   : > { %842 = vmatprep.mubr.f32.mxu0 %v2893_v0  ;;  %1003 = vmatprep.mubr.f32.mxu1 %v2893_v0 }
  0x98   : > { %2612 = vmatmul.mubr.msk.f32.gmra.mxu0 %vm353_vm0, %v3174_v43  ;;  %2628 = vmatmul.mubr.msk.f32.gmra.mxu1 %vm353_vm0, %v3174_v43 }
  0x99   : > { %848 = vmatprep.mubr.f32.mxu0 %v2893_v0  ;;  %1009 = vmatprep.mubr.f32.mxu1 %v2893_v0 }
  0x9c   : > { %2613 = vmatmul.mubr.msk.f32.gmra.mxu0 %vm353_vm0, %v3191_v46  ;;  %2629 = vmatmul.mubr.msk.f32.gmra.mxu1 %vm353_vm0, %v3191_v46 }
  0x9d   : > { %854 = vmatprep.mubr.f32.mxu0 %v2893_v0  ;;  %1015 = vmatprep.mubr.f32.mxu1 %v2893_v0 }
  0xa0   : > { %2614 = vmatmul.mubr.msk.f32.gmra.mxu0 %vm353_vm0, %v3202_v47  ;;  %2630 = vmatmul.mubr.msk.f32.gmra.mxu1 %vm353_vm0, %v3202_v47 }
  0xa1   : > { %860 = vmatprep.mubr.f32.mxu0 %v2893_v0  ;;  %1021 = vmatprep.mubr.f32.mxu1 %v2893_v0 }
  0xa4   : > { %2615 = vmatmul.mubr.msk.f32.gmra.mxu0 %vm353_vm0, %v3213_v48  ;;  %2631 = vmatmul.mubr.msk.f32.gmra.mxu1 %vm353_vm0, %v3213_v48 }
  0xa5   : > { %866 = vmatprep.mubr.f32.mxu0 %v2893_v0  ;;  %1027 = vmatprep.mubr.f32.mxu1 %v2893_v0 }
  0xa8   : > { %2616 = vmatmul.mubr.msk.f32.gmra.mxu0 %vm353_vm0, %v3224_v49  ;;  %2632 = vmatmul.mubr.msk.f32.gmra.mxu1 %vm353_vm0, %v3224_v49 }
  0xa9   : > { %872 = vmatprep.mubr.f32.mxu0 %v2893_v0  ;;  %1033 = vmatprep.mubr.f32.mxu1 %v2893_v0 }
  0xac   : > { %2617 = vmatmul.mubr.msk.f32.gmra.mxu0 %vm353_vm0, %v3235_v50  ;;  %2633 = vmatmul.mubr.msk.f32.gmra.mxu1 %vm353_vm0, %v3235_v50 }
  0xad   : > { %878 = vmatprep.mubr.f32.mxu0 %v2893_v0  ;;  %1039 = vmatprep.mubr.f32.mxu1 %v2893_v0 }
  0xb0   : > { %2618 = vmatmul.mubr.msk.f32.gmra.mxu0 %vm353_vm0, %v3246_v51  ;;  %2634 = vmatmul.mubr.msk.f32.gmra.mxu1 %vm353_vm0, %v3246_v51 }
  0xb1   : > { %1110 = vmatprep.mubr.f32.mxu0 %v2893_v0  ;;  %1271 = vmatprep.mubr.f32.mxu1 %v2893_v0 }
  0xb4   : > { %2635 = vmatmul.mubr.msk.f32.vlgmr.msra.gmra.mxu0 %vm353_vm0, %v3023_v10  ;;  %2651 = vmatmul.mubr.msk.f32.vlgmr.msra.gmra.mxu1 %vm353_vm0, %v3023_v10 }
  0xb5   : > { %1397 = vmatpush1.msra.mxu0 %v253_v60  ;;  %1558 = vmatpush1.msra.mxu1 %v255_v61 }
  0xb6   : > { %1116 = vmatprep.mubr.f32.mxu0 %v2893_v0  ;;  %1277 = vmatprep.mubr.f32.mxu1 %v2893_v0 }
  0xb7   : > { %1398 = vmatprep.subr.mxu0 %v238_v62  ;;  %1559 = vmatprep.subr.mxu1 %v240_v63 }
  0xb8   : > { %2636 = vmatmul.mubr.msk.f32.gmra.mxu0 %vm353_vm0, %v3036_v15  ;;  %2652 = vmatmul.mubr.msk.f32.gmra.mxu1 %vm353_vm0, %v3036_v15 }
  0xb9   : > { %1122 = vmatprep.mubr.f32.mxu0 %v2893_v0  ;;  %1283 = vmatprep.mubr.f32.mxu1 %v2893_v0 }
  0xba   : > { %1399 = vmatpush1.msra.mxu0 %v237_v1  ;;  %1560 = vmatpush1.msra.mxu1 %v239_v2  ;;  %v3460_v3 = vpop.permute.xlu0 %275 }
  0xbc   : > { %2637 = vmatmul.mubr.msk.f32.gmra.mxu0 %vm353_vm0, %v3053_v20  ;;  %2653 = vmatmul.mubr.msk.f32.gmra.mxu1 %vm353_vm0, %v3053_v20 }
  0xbd   : > { %1128 = vmatprep.mubr.f32.mxu0 %v2893_v0  ;;  %1289 = vmatprep.mubr.f32.mxu1 %v2893_v0 }
  0xbe   : > { %v3473_v16 = vpop.permute.xlu0 %280 }
  0xc0   : > { %2638 = vmatmul.mubr.msk.f32.gmra.mxu0 %vm353_vm0, %v3072_v25  ;;  %2654 = vmatmul.mubr.msk.f32.gmra.mxu1 %vm353_vm0, %v3072_v25 }
  0xc1   : > { %1134 = vmatprep.mubr.f32.mxu0 %v2893_v0  ;;  %1295 = vmatprep.mubr.f32.mxu1 %v2893_v0 }
  0xc4   : > { %2639 = vmatmul.mubr.msk.f32.gmra.mxu0 %vm353_vm0, %v3089_v28  ;;  %2655 = vmatmul.mubr.msk.f32.gmra.mxu1 %vm353_vm0, %v3089_v28 }
  0xc5   : > { %1140 = vmatprep.mubr.f32.mxu0 %v2893_v0  ;;  %1301 = vmatprep.mubr.f32.mxu1 %v2893_v0 }
  0xc8   : > { %2640 = vmatmul.mubr.msk.f32.gmra.mxu0 %vm353_vm0, %v3106_v31  ;;  %2656 = vmatmul.mubr.msk.f32.gmra.mxu1 %vm353_vm0, %v3106_v31 }
  0xc9   : > { %1146 = vmatprep.mubr.f32.mxu0 %v2893_v0  ;;  %1307 = vmatprep.mubr.f32.mxu1 %v2893_v0 }
  0xcc   : > { %2641 = vmatmul.mubr.msk.f32.gmra.mxu0 %vm353_vm0, %v3123_v34  ;;  %2657 = vmatmul.mubr.msk.f32.gmra.mxu1 %vm353_vm0, %v3123_v34 }
  0xcd   : > { %1152 = vmatprep.mubr.f32.mxu0 %v2893_v0  ;;  %1313 = vmatprep.mubr.f32.mxu1 %v2893_v0 }
  0xd0   : > { %2642 = vmatmul.mubr.msk.f32.gmra.mxu0 %vm353_vm0, %v3140_v37  ;;  %2658 = vmatmul.mubr.msk.f32.gmra.mxu1 %vm353_vm0, %v3140_v37 }
  0xd1   : > { %1158 = vmatprep.mubr.f32.mxu0 %v2893_v0  ;;  %1319 = vmatprep.mubr.f32.mxu1 %v2893_v0 }
  0xd4   : > { %2643 = vmatmul.mubr.msk.f32.gmra.mxu0 %vm353_vm0, %v3157_v40  ;;  %2659 = vmatmul.mubr.msk.f32.gmra.mxu1 %vm353_vm0, %v3157_v40 }
  0xd5   : > { %1164 = vmatprep.mubr.f32.mxu0 %v2893_v0  ;;  %1325 = vmatprep.mubr.f32.mxu1 %v2893_v0 }
  0xd8   : > { %2644 = vmatmul.mubr.msk.f32.gmra.mxu0 %vm353_vm0, %v3174_v43  ;;  %2660 = vmatmul.mubr.msk.f32.gmra.mxu1 %vm353_vm0, %v3174_v43 }
  0xd9   : > { %1170 = vmatprep.mubr.f32.mxu0 %v2893_v0  ;;  %1331 = vmatprep.mubr.f32.mxu1 %v2893_v0 }
  0xdc   : > { %2645 = vmatmul.mubr.msk.f32.gmra.mxu0 %vm353_vm0, %v3191_v46  ;;  %2661 = vmatmul.mubr.msk.f32.gmra.mxu1 %vm353_vm0, %v3191_v46 }
  0xdd   : > { %1176 = vmatprep.mubr.f32.mxu0 %v2893_v0  ;;  %1337 = vmatprep.mubr.f32.mxu1 %v2893_v0 }
  0xe0   : > { %2646 = vmatmul.mubr.msk.f32.gmra.mxu0 %vm353_vm0, %v3202_v47  ;;  %2662 = vmatmul.mubr.msk.f32.gmra.mxu1 %vm353_vm0, %v3202_v47 }
  0xe1   : > { %1182 = vmatprep.mubr.f32.mxu0 %v2893_v0  ;;  %1343 = vmatprep.mubr.f32.mxu1 %v2893_v0 }
  0xe4   : > { %2647 = vmatmul.mubr.msk.f32.gmra.mxu0 %vm353_vm0, %v3213_v48  ;;  %2663 = vmatmul.mubr.msk.f32.gmra.mxu1 %vm353_vm0, %v3213_v48 }
  0xe5   : > { %1188 = vmatprep.mubr.f32.mxu0 %v2893_v0  ;;  %1349 = vmatprep.mubr.f32.mxu1 %v2893_v0 }
  0xe8   : > { %2648 = vmatmul.mubr.msk.f32.gmra.mxu0 %vm353_vm0, %v3224_v49  ;;  %2664 = vmatmul.mubr.msk.f32.gmra.mxu1 %vm353_vm0, %v3224_v49 }
  0xe9   : > { %1194 = vmatprep.mubr.f32.mxu0 %v2893_v0  ;;  %1355 = vmatprep.mubr.f32.mxu1 %v2893_v0 }
  0xec   : > { %2649 = vmatmul.mubr.msk.f32.gmra.mxu0 %vm353_vm0, %v3235_v50  ;;  %2665 = vmatmul.mubr.msk.f32.gmra.mxu1 %vm353_vm0, %v3235_v50 }
  0xed   : > { %1200 = vmatprep.mubr.f32.mxu0 %v2893_v0  ;;  %1361 = vmatprep.mubr.f32.mxu1 %v2893_v0 }
  0xf0   : > { %2650 = vmatmul.mubr.msk.f32.gmra.mxu0 %vm353_vm0, %v3246_v51  ;;  %2666 = vmatmul.mubr.msk.f32.gmra.mxu1 %vm353_vm0, %v3246_v51 }
  0xf1   : > { %1432 = vmatprep.mubr.f32.mxu0 %v2893_v0  ;;  %1593 = vmatprep.mubr.f32.mxu1 %v2893_v0 }
  0xf4   : > { %v468_v4 = vpop.f32.mrf.mxu0  ;;  %v629_v5 = vpop.f32.mrf.mxu1  ;;  %2667 = vmatmul.mubr.msk.f32.vlgmr.msra.gmra.mxu0 %vm353_vm0, %v3023_v10  ;;  %2683 = vmatmul.mubr.msk.f32.vlgmr.msra.gmra.mxu1 %vm353_vm0, %v3023_v10 }
  0xf5   : > { %v469_v6 = vadd.f32 %v468_v4, %v3460_v3  ;;  %v630_v7 = vadd.f32 %v629_v5, %v3460_v3  ;;  %1438 = vmatprep.mubr.f32.mxu0 %v2893_v0  ;;  %1599 = vmatprep.mubr.f32.mxu1 %v2893_v0  ;;  %v3475_v10 = vpop.permute.xlu1 %285 }
  0xf6   : > { %v470_v8 = vpop.f32.mrf.mxu0  ;;  %v631_v9 = vpop.f32.mrf.mxu1 }
  0xf7   : > { %v1690_v11 = vmax.f32 %v469_v6, 0.0  ;;  %v1692_v12 = vmax.f32 %v630_v7, 0.0  ;;  %v471_v13 = vadd.f32 %v470_v8, %v3460_v3  ;;  %v632_v14 = vadd.f32 %v631_v9, %v3460_v3 }
  0xf8   : > { %v474_v17 = vpop.f32.mrf.mxu0  ;;  %v635_v18 = vpop.f32.mrf.mxu1  ;;  %2668 = vmatmul.mubr.msk.f32.gmra.mxu0 %vm353_vm0, %v3036_v15  ;;  %2684 = vmatmul.mubr.msk.f32.gmra.mxu1 %vm353_vm0, %v3036_v15 }
  0xf9   : > { %v1946_v19 = vmin.f32 %v1690_v11, 6.0  ;;  %v1948_v21 = vmin.f32 %v1692_v12, 6.0  ;;  %v1691_v22 = vmax.f32 %v471_v13, 0.0  ;;  %v1693_v23 = vmax.f32 %v632_v14, 0.0  ;;  %1444 = vmatprep.mubr.f32.mxu0 %v2893_v0  ;;  %1605 = vmatprep.mubr.f32.mxu1 %v2893_v0  ;;  %v3501_v51 = vpop.permute.xlu1 %290  ;;  %v3521_v13 = vpop.permute.xlu0 %295 }
  0xfa   : > { %v475_v24 = vadd.f32 %v474_v17, %v3473_v16  ;;  %v636_v26 = vadd.f32 %v635_v18, %v3473_v16  ;;  %v476_v27 = vpop.f32.mrf.mxu0  ;;  %v637_v29 = vpop.f32.mrf.mxu1 }
  0xfb   : > { %2202 = vst [vmem:[%s3485_s9] sm:$0xff] %v1946_v19  ;;  %2204 = vst [vmem:[%s3485_s9 + $0x10] sm:$0xff] %v1948_v21  ;;  %v1947_v15 = vmin.f32 %v1691_v22, 6.0  ;;  %v1949_v30 = vmin.f32 %v1693_v23, 6.0  ;;  %v477_v32 = vadd.f32 %v476_v27, %v3473_v16  ;;  %v638_v33 = vadd.f32 %v637_v29, %v3473_v16 }
  0xfc   : > { %v1706_v35 = vmax.f32 %v475_v24, 0.0  ;;  %v1708_v36 = vmax.f32 %v636_v26, 0.0  ;;  %v480_v38 = vpop.f32.mrf.mxu0  ;;  %v641_v39 = vpop.f32.mrf.mxu1  ;;  %2669 = vmatmul.mubr.msk.f32.gmra.mxu0 %vm353_vm0, %v3053_v20  ;;  %2685 = vmatmul.mubr.msk.f32.gmra.mxu1 %vm353_vm0, %v3053_v20 }
  0xfd   : > { %2203 = vst [vmem:[%s3485_s9 + $0x8] sm:$0xff] %v1947_v15  ;;  %2205 = vst [vmem:[%s3485_s9 + $0x18] sm:$0xff] %v1949_v30  ;;  %v1707_v41 = vmax.f32 %v477_v32, 0.0  ;;  %v1709_v42 = vmax.f32 %v638_v33, 0.0  ;;  %v481_v44 = vadd.f32 %v480_v38, %v3475_v10  ;;  %v642_v45 = vadd.f32 %v641_v39, %v3475_v10  ;;  %1450 = vmatprep.mubr.f32.mxu0 %v2893_v0  ;;  %v3529_v26 = vpop.permute.xlu1 %300 }
  0xfe   : > { %1611 = vmatprep.mubr.f32.mxu1 %v2893_v0  ;;  %v1962_v52 = vmin.f32 %v1706_v35, 6.0  ;;  %v1964_v53 = vmin.f32 %v1708_v36, 6.0  ;;  %v482_v20 = vpop.f32.mrf.mxu0  ;;  %v643_v54 = vpop.f32.mrf.mxu1 }
  0xff   : > { %v1963_v55 = vmin.f32 %v1707_v41, 6.0  ;;  %v1965_v56 = vmin.f32 %v1709_v42, 6.0  ;;  %v1722_v57 = vmax.f32 %v481_v44, 0.0  ;;  %v1724_v58 = vmax.f32 %v642_v45, 0.0 }
 0x100   : > { %2218 = vst [vmem:[%s3485_s9 + $0x80] sm:$0xff] %v1962_v52  ;;  %2220 = vst [vmem:[%s3485_s9 + $0x90] sm:$0xff] %v1964_v53  ;;  %v483_v59 = vadd.f32 %v482_v20, %v3475_v10  ;;  %v644_v60 = vadd.f32 %v643_v54, %v3475_v10  ;;  %v486_v61 = vpop.f32.mrf.mxu0  ;;  %v647_v62 = vpop.f32.mrf.mxu1  ;;  %2670 = vmatmul.mubr.msk.f32.gmra.mxu0 %vm353_vm0, %v3072_v25  ;;  %2686 = vmatmul.mubr.msk.f32.gmra.mxu1 %vm353_vm0, %v3072_v25 }
 0x101   : > { %2219 = vst [vmem:[%s3485_s9 + $0x88] sm:$0xff] %v1963_v55  ;;  %2221 = vst [vmem:[%s3485_s9 + $0x98] sm:$0xff] %v1965_v56  ;;  %v1978_v63 = vmin.f32 %v1722_v57, 6.0  ;;  %v1980_v1 = vmin.f32 %v1724_v58, 6.0  ;;  %v487_v2 = vadd.f32 %v486_v61, %v3501_v51  ;;  %v648_v4 = vadd.f32 %v647_v62, %v3501_v51  ;;  %1456 = vmatprep.mubr.f32.mxu0 %v2893_v0  ;;  %v3549_v53 = vpop.permute.xlu0 %305 }
 0x102   : > { %1617 = vmatprep.mubr.f32.mxu1 %v2893_v0  ;;  %v1723_v5 = vmax.f32 %v483_v59, 0.0  ;;  %v1725_v6 = vmax.f32 %v644_v60, 0.0  ;;  %v488_v7 = vpop.f32.mrf.mxu0  ;;  %v649_v8 = vpop.f32.mrf.mxu1 }
 0x103   : > { %2234 = vst [vmem:[%s3485_s9 + $0x100] sm:$0xff] %v1978_v63  ;;  %2236 = vst [vmem:[%s3485_s9 + $0x110] sm:$0xff] %v1980_v1  ;;  %v1738_v9 = vmax.f32 %v487_v2, 0.0  ;;  %v1740_v25 = vmax.f32 %v648_v4, 0.0  ;;  %v489_v11 = vadd.f32 %v488_v7, %v3501_v51  ;;  %v650_v12 = vadd.f32 %v649_v8, %v3501_v51 }
 0x104   : > { %v1979_v14 = vmin.f32 %v1723_v5, 6.0  ;;  %v1981_v17 = vmin.f32 %v1725_v6, 6.0  ;;  %v492_v18 = vpop.f32.mrf.mxu0  ;;  %v653_v19 = vpop.f32.mrf.mxu1  ;;  %2671 = vmatmul.mubr.msk.f32.gmra.mxu0 %vm353_vm0, %v3089_v28  ;;  %2687 = vmatmul.mubr.msk.f32.gmra.mxu1 %vm353_vm0, %v3089_v28 }
 0x105   : > { %v1994_v21 = vmin.f32 %v1738_v9, 6.0  ;;  %v1996_v22 = vmin.f32 %v1740_v25, 6.0  ;;  %v1739_v23 = vmax.f32 %v489_v11, 0.0  ;;  %v1741_v24 = vmax.f32 %v650_v12, 0.0  ;;  %1462 = vmatprep.mubr.f32.mxu0 %v2893_v0  ;;  %1623 = vmatprep.mubr.f32.mxu1 %v2893_v0 }
 0x106   : > { %2235 = vst [vmem:[%s3485_s9 + $0x108] sm:$0xff] %v1979_v14  ;;  %2237 = vst [vmem:[%s3485_s9 + $0x118] sm:$0xff] %v1981_v17  ;;  %v493_v27 = vadd.f32 %v492_v18, %v3521_v13  ;;  %v654_v29 = vadd.f32 %v653_v19, %v3521_v13  ;;  %v494_v15 = vpop.f32.mrf.mxu0  ;;  %v655_v28 = vpop.f32.mrf.mxu1 }
 0x107   : > { %2250 = vst [vmem:[%s3485_s9 + $0x180] sm:$0xff] %v1994_v21  ;;  %2252 = vst [vmem:[%s3485_s9 + $0x190] sm:$0xff] %v1996_v22  ;;  %v1995_v30 = vmin.f32 %v1739_v23, 6.0  ;;  %v1997_v32 = vmin.f32 %v1741_v24, 6.0  ;;  %v495_v33 = vadd.f32 %v494_v15, %v3521_v13  ;;  %v656_v35 = vadd.f32 %v655_v28, %v3521_v13  ;;  %v3569_v14 = vpop.permute.xlu1 %310 }
 0x108   : > { %v1754_v36 = vmax.f32 %v493_v27, 0.0  ;;  %v1756_v38 = vmax.f32 %v654_v29, 0.0  ;;  %v498_v39 = vpop.f32.mrf.mxu0  ;;  %v659_v41 = vpop.f32.mrf.mxu1  ;;  %2672 = vmatmul.mubr.msk.f32.gmra.mxu0 %vm353_vm0, %v3106_v31  ;;  %2688 = vmatmul.mubr.msk.f32.gmra.mxu1 %vm353_vm0, %v3106_v31 }
 0x109   : > { %2251 = vst [vmem:[%s3485_s9 + $0x188] sm:$0xff] %v1995_v30  ;;  %2253 = vst [vmem:[%s3485_s9 + $0x198] sm:$0xff] %v1997_v32  ;;  %v1755_v42 = vmax.f32 %v495_v33, 0.0  ;;  %v1757_v44 = vmax.f32 %v656_v35, 0.0  ;;  %v499_v45 = vadd.f32 %v498_v39, %v3529_v26  ;;  %v660_v52 = vadd.f32 %v659_v41, %v3529_v26  ;;  %1468 = vmatprep.mubr.f32.mxu0 %v2893_v0  ;;  %v3577_v29 = vpop.permute.xlu0 %315 }
 0x10a   : > { %1629 = vmatprep.mubr.f32.mxu1 %v2893_v0  ;;  %v2010_v20 = vmin.f32 %v1754_v36, 6.0  ;;  %v2012_v54 = vmin.f32 %v1756_v38, 6.0  ;;  %v500_v31 = vpop.f32.mrf.mxu0  ;;  %v661_v55 = vpop.f32.mrf.mxu1 }
 0x10b   : > { %v2011_v56 = vmin.f32 %v1755_v42, 6.0  ;;  %v2013_v57 = vmin.f32 %v1757_v44, 6.0  ;;  %v1770_v58 = vmax.f32 %v499_v45, 0.0  ;;  %v1772_v59 = vmax.f32 %v660_v52, 0.0 }
 0x10c   : > { %2266 = vst [vmem:[%s3485_s9 + $0x200] sm:$0xff] %v2010_v20  ;;  %2268 = vst [vmem:[%s3485_s9 + $0x210] sm:$0xff] %v2012_v54  ;;  %v501_v60 = vadd.f32 %v500_v31, %v3529_v26  ;;  %v662_v61 = vadd.f32 %v661_v55, %v3529_v26  ;;  %v504_v62 = vpop.f32.mrf.mxu0  ;;  %v665_v63 = vpop.f32.mrf.mxu1  ;;  %2673 = vmatmul.mubr.msk.f32.gmra.mxu0 %vm353_vm0, %v3123_v34  ;;  %2689 = vmatmul.mubr.msk.f32.gmra.mxu1 %vm353_vm0, %v3123_v34 }
 0x10d   : > { %2267 = vst [vmem:[%s3485_s9 + $0x208] sm:$0xff] %v2011_v56  ;;  %2269 = vst [vmem:[%s3485_s9 + $0x218] sm:$0xff] %v2013_v57  ;;  %v2026_v1 = vmin.f32 %v1770_v58, 6.0  ;;  %v2028_v2 = vmin.f32 %v1772_v59, 6.0  ;;  %v505_v4 = vadd.f32 %v504_v62, %v3549_v53  ;;  %v666_v5 = vadd.f32 %v665_v63, %v3549_v53  ;;  %1474 = vmatprep.mubr.f32.mxu0 %v2893_v0  ;;  %v3597_v54 = vpop.permute.xlu1 %320 }
 0x10e   : > { %1635 = vmatprep.mubr.f32.mxu1 %v2893_v0  ;;  %v1771_v6 = vmax.f32 %v501_v60, 0.0  ;;  %v1773_v7 = vmax.f32 %v662_v61, 0.0  ;;  %v506_v8 = vpop.f32.mrf.mxu0  ;;  %v667_v9 = vpop.f32.mrf.mxu1 }
 0x10f   : > { %2282 = vst [vmem:[%s3485_s9 + $0x280] sm:$0xff] %v2026_v1  ;;  %2284 = vst [vmem:[%s3485_s9 + $0x290] sm:$0xff] %v2028_v2  ;;  %v1786_v25 = vmax.f32 %v505_v4, 0.0  ;;  %v1788_v34 = vmax.f32 %v666_v5, 0.0  ;;  %v507_v11 = vadd.f32 %v506_v8, %v3549_v53  ;;  %v668_v12 = vadd.f32 %v667_v9, %v3549_v53 }
 0x110   : > { %v2027_v17 = vmin.f32 %v1771_v6, 6.0  ;;  %v2029_v18 = vmin.f32 %v1773_v7, 6.0  ;;  %v510_v19 = vpop.f32.mrf.mxu0  ;;  %v671_v21 = vpop.f32.mrf.mxu1  ;;  %2674 = vmatmul.mubr.msk.f32.gmra.mxu0 %vm353_vm0, %v3140_v37  ;;  %2690 = vmatmul.mubr.msk.f32.gmra.mxu1 %vm353_vm0, %v3140_v37 }
 0x111   : > { %v2042_v22 = vmin.f32 %v1786_v25, 6.0  ;;  %v2044_v23 = vmin.f32 %v1788_v34, 6.0  ;;  %v1787_v24 = vmax.f32 %v507_v11, 0.0  ;;  %v1789_v27 = vmax.f32 %v668_v12, 0.0  ;;  %1480 = vmatprep.mubr.f32.mxu0 %v2893_v0  ;;  %1641 = vmatprep.mubr.f32.mxu1 %v2893_v0 }
 0x112   : > { %2283 = vst [vmem:[%s3485_s9 + $0x288] sm:$0xff] %v2027_v17  ;;  %2285 = vst [vmem:[%s3485_s9 + $0x298] sm:$0xff] %v2029_v18  ;;  %v511_v15 = vadd.f32 %v510_v19, %v3569_v14  ;;  %v672_v28 = vadd.f32 %v671_v21, %v3569_v14  ;;  %v512_v30 = vpop.f32.mrf.mxu0  ;;  %v673_v37 = vpop.f32.mrf.mxu1 }
 0x113   : > { %2298 = vst [vmem:[%s3485_s9 + $0x300] sm:$0xff] %v2042_v22  ;;  %2300 = vst [vmem:[%s3485_s9 + $0x310] sm:$0xff] %v2044_v23  ;;  %v2043_v32 = vmin.f32 %v1787_v24, 6.0  ;;  %v2045_v33 = vmin.f32 %v1789_v27, 6.0  ;;  %v513_v35 = vadd.f32 %v512_v30, %v3569_v14  ;;  %v674_v36 = vadd.f32 %v673_v37, %v3569_v14  ;;  %v3617_v17 = vpop.permute.xlu0 %325 }
 0x114   : > { %v1802_v38 = vmax.f32 %v511_v15, 0.0  ;;  %v1804_v39 = vmax.f32 %v672_v28, 0.0  ;;  %v516_v41 = vpop.f32.mrf.mxu0  ;;  %v677_v42 = vpop.f32.mrf.mxu1  ;;  %2675 = vmatmul.mubr.msk.f32.gmra.mxu0 %vm353_vm0, %v3157_v40  ;;  %2691 = vmatmul.mubr.msk.f32.gmra.mxu1 %vm353_vm0, %v3157_v40 }
 0x115   : > { %2299 = vst [vmem:[%s3485_s9 + $0x308] sm:$0xff] %v2043_v32  ;;  %2301 = vst [vmem:[%s3485_s9 + $0x318] sm:$0xff] %v2045_v33  ;;  %v1803_v44 = vmax.f32 %v513_v35, 0.0  ;;  %v1805_v45 = vmax.f32 %v674_v36, 0.0  ;;  %v517_v52 = vadd.f32 %v516_v41, %v3577_v29  ;;  %v678_v20 = vadd.f32 %v677_v42, %v3577_v29  ;;  %1486 = vmatprep.mubr.f32.mxu0 %v2893_v0  ;;  %v3625_v28 = vpop.permute.xlu1 %330 }
 0x116   : > { %1647 = vmatprep.mubr.f32.mxu1 %v2893_v0  ;;  %v2058_v31 = vmin.f32 %v1802_v38, 6.0  ;;  %v2060_v55 = vmin.f32 %v1804_v39, 6.0  ;;  %v518_v40 = vpop.f32.mrf.mxu0  ;;  %v679_v56 = vpop.f32.mrf.mxu1 }
 0x117   : > { %v2059_v57 = vmin.f32 %v1803_v44, 6.0  ;;  %v2061_v58 = vmin.f32 %v1805_v45, 6.0  ;;  %v1818_v59 = vmax.f32 %v517_v52, 0.0  ;;  %v1820_v60 = vmax.f32 %v678_v20, 0.0 }
 0x118   : > { %2314 = vst [vmem:[%s3485_s9 + $0x380] sm:$0xff] %v2058_v31  ;;  %2316 = vst [vmem:[%s3485_s9 + $0x390] sm:$0xff] %v2060_v55  ;;  %v519_v61 = vadd.f32 %v518_v40, %v3577_v29  ;;  %v680_v62 = vadd.f32 %v679_v56, %v3577_v29  ;;  %v522_v63 = vpop.f32.mrf.mxu0  ;;  %v683_v1 = vpop.f32.mrf.mxu1  ;;  %2676 = vmatmul.mubr.msk.f32.gmra.mxu0 %vm353_vm0, %v3174_v43  ;;  %2692 = vmatmul.mubr.msk.f32.gmra.mxu1 %vm353_vm0, %v3174_v43 }
 0x119   : > { %2315 = vst [vmem:[%s3485_s9 + $0x388] sm:$0xff] %v2059_v57  ;;  %2317 = vst [vmem:[%s3485_s9 + $0x398] sm:$0xff] %v2061_v58  ;;  %v2074_v2 = vmin.f32 %v1818_v59, 6.0  ;;  %v2076_v4 = vmin.f32 %v1820_v60, 6.0  ;;  %v523_v5 = vadd.f32 %v522_v63, %v3597_v54  ;;  %v684_v6 = vadd.f32 %v683_v1, %v3597_v54  ;;  %1492 = vmatprep.mubr.f32.mxu0 %v2893_v0  ;;  %v3645_v55 = vpop.permute.xlu0 %335 }
 0x11a   : > { %1653 = vmatprep.mubr.f32.mxu1 %v2893_v0  ;;  %v1819_v7 = vmax.f32 %v519_v61, 0.0  ;;  %v1821_v8 = vmax.f32 %v680_v62, 0.0  ;;  %v524_v9 = vpop.f32.mrf.mxu0  ;;  %v685_v25 = vpop.f32.mrf.mxu1 }
 0x11b   : > { %2330 = vst [vmem:[%s3485_s9 + $0x400] sm:$0xff] %v2074_v2  ;;  %2332 = vst [vmem:[%s3485_s9 + $0x410] sm:$0xff] %v2076_v4  ;;  %v1834_v34 = vmax.f32 %v523_v5, 0.0  ;;  %v1836_v43 = vmax.f32 %v684_v6, 0.0  ;;  %v525_v11 = vadd.f32 %v524_v9, %v3597_v54  ;;  %v686_v12 = vadd.f32 %v685_v25, %v3597_v54 }
 0x11c   : > { %v2075_v18 = vmin.f32 %v1819_v7, 6.0  ;;  %v2077_v19 = vmin.f32 %v1821_v8, 6.0  ;;  %v528_v21 = vpop.f32.mrf.mxu0  ;;  %v689_v22 = vpop.f32.mrf.mxu1  ;;  %2677 = vmatmul.mubr.msk.f32.gmra.mxu0 %vm353_vm0, %v3191_v46  ;;  %2693 = vmatmul.mubr.msk.f32.gmra.mxu1 %vm353_vm0, %v3191_v46 }
 0x11d   : > { %v2090_v23 = vmin.f32 %v1834_v34, 6.0  ;;  %v2092_v24 = vmin.f32 %v1836_v43, 6.0  ;;  %v1835_v27 = vmax.f32 %v525_v11, 0.0  ;;  %v1837_v15 = vmax.f32 %v686_v12, 0.0  ;;  %1498 = vmatprep.mubr.f32.mxu0 %v2893_v0  ;;  %1659 = vmatprep.mubr.f32.mxu1 %v2893_v0 }
 0x11e   : > { %2331 = vst [vmem:[%s3485_s9 + $0x408] sm:$0xff] %v2075_v18  ;;  %2333 = vst [vmem:[%s3485_s9 + $0x418] sm:$0xff] %v2077_v19  ;;  %v529_v30 = vadd.f32 %v528_v21, %v3617_v17  ;;  %v690_v37 = vadd.f32 %v689_v22, %v3617_v17  ;;  %v530_v32 = vpop.f32.mrf.mxu0  ;;  %v691_v46 = vpop.f32.mrf.mxu1 }
 0x11f   : > { %2346 = vst [vmem:[%s3485_s9 + $0x480] sm:$0xff] %v2090_v23  ;;  %2348 = vst [vmem:[%s3485_s9 + $0x490] sm:$0xff] %v2092_v24  ;;  %v2091_v33 = vmin.f32 %v1835_v27, 6.0  ;;  %v2093_v35 = vmin.f32 %v1837_v15, 6.0  ;;  %v531_v36 = vadd.f32 %v530_v32, %v3617_v17  ;;  %v692_v38 = vadd.f32 %v691_v46, %v3617_v17  ;;  %v3665_v18 = vpop.permute.xlu1 %340 }
 0x120   : > { %v1850_v39 = vmax.f32 %v529_v30, 0.0  ;;  %v1852_v41 = vmax.f32 %v690_v37, 0.0  ;;  %v534_v42 = vpop.f32.mrf.mxu0  ;;  %v695_v44 = vpop.f32.mrf.mxu1  ;;  %2678 = vmatmul.mubr.msk.f32.gmra.mxu0 %vm353_vm0, %v3202_v47  ;;  %2694 = vmatmul.mubr.msk.f32.gmra.mxu1 %vm353_vm0, %v3202_v47 }
 0x121   : > { %2347 = vst [vmem:[%s3485_s9 + $0x488] sm:$0xff] %v2091_v33  ;;  %2349 = vst [vmem:[%s3485_s9 + $0x498] sm:$0xff] %v2093_v35  ;;  %v1851_v45 = vmax.f32 %v531_v36, 0.0  ;;  %v1853_v52 = vmax.f32 %v692_v38, 0.0  ;;  %v535_v20 = vadd.f32 %v534_v42, %v3625_v28  ;;  %v696_v31 = vadd.f32 %v695_v44, %v3625_v28  ;;  %1504 = vmatprep.mubr.f32.mxu0 %v2893_v0  ;;  %v3673_v37 = vpop.permute.xlu0 %345 }
 0x122   : > { %1665 = vmatprep.mubr.f32.mxu1 %v2893_v0  ;;  %v2106_v40 = vmin.f32 %v1850_v39, 6.0  ;;  %v2108_v56 = vmin.f32 %v1852_v41, 6.0  ;;  %v536_v47 = vpop.f32.mrf.mxu0  ;;  %v697_v57 = vpop.f32.mrf.mxu1 }
 0x123   : > { %v2107_v58 = vmin.f32 %v1851_v45, 6.0  ;;  %v2109_v59 = vmin.f32 %v1853_v52, 6.0  ;;  %v1866_v60 = vmax.f32 %v535_v20, 0.0  ;;  %v1868_v61 = vmax.f32 %v696_v31, 0.0 }
 0x124   : > { %2362 = vst [vmem:[%s3485_s9 + $0x500] sm:$0xff] %v2106_v40  ;;  %2364 = vst [vmem:[%s3485_s9 + $0x510] sm:$0xff] %v2108_v56  ;;  %v537_v62 = vadd.f32 %v536_v47, %v3625_v28  ;;  %v698_v63 = vadd.f32 %v697_v57, %v3625_v28  ;;  %v540_v1 = vpop.f32.mrf.mxu0  ;;  %v701_v2 = vpop.f32.mrf.mxu1  ;;  %2679 = vmatmul.mubr.msk.f32.gmra.mxu0 %vm353_vm0, %v3213_v48  ;;  %2695 = vmatmul.mubr.msk.f32.gmra.mxu1 %vm353_vm0, %v3213_v48 }
 0x125   : > { %2363 = vst [vmem:[%s3485_s9 + $0x508] sm:$0xff] %v2107_v58  ;;  %2365 = vst [vmem:[%s3485_s9 + $0x518] sm:$0xff] %v2109_v59  ;;  %v2122_v4 = vmin.f32 %v1866_v60, 6.0  ;;  %v2124_v5 = vmin.f32 %v1868_v61, 6.0  ;;  %v541_v6 = vadd.f32 %v540_v1, %v3645_v55  ;;  %v702_v7 = vadd.f32 %v701_v2, %v3645_v55  ;;  %1510 = vmatprep.mubr.f32.mxu0 %v2893_v0  ;;  %v3693_v56 = vpop.permute.xlu1 %350 }
 0x126   : > { %1671 = vmatprep.mubr.f32.mxu1 %v2893_v0  ;;  %v1867_v8 = vmax.f32 %v537_v62, 0.0  ;;  %v1869_v9 = vmax.f32 %v698_v63, 0.0  ;;  %v542_v25 = vpop.f32.mrf.mxu0  ;;  %v703_v34 = vpop.f32.mrf.mxu1 }
 0x127   : > { %2378 = vst [vmem:[%s3485_s9 + $0x580] sm:$0xff] %v2122_v4  ;;  %2380 = vst [vmem:[%s3485_s9 + $0x590] sm:$0xff] %v2124_v5  ;;  %v1882_v43 = vmax.f32 %v541_v6, 0.0  ;;  %v1884_v48 = vmax.f32 %v702_v7, 0.0  ;;  %v543_v11 = vadd.f32 %v542_v25, %v3645_v55  ;;  %v704_v12 = vadd.f32 %v703_v34, %v3645_v55  ;;  %v2778_v4 = vld [vmem:[%s4157_s1 + $0x78] sm:$0xff] }
 0x128   : > { %v2123_v19 = vmin.f32 %v1867_v8, 6.0  ;;  %v2125_v21 = vmin.f32 %v1869_v9, 6.0  ;;  %v546_v22 = vpop.f32.mrf.mxu0  ;;  %v707_v23 = vpop.f32.mrf.mxu1  ;;  %2680 = vmatmul.mubr.msk.f32.gmra.mxu0 %vm353_vm0, %v3224_v49  ;;  %2696 = vmatmul.mubr.msk.f32.gmra.mxu1 %vm353_vm0, %v3224_v49 }
 0x129   : > { %v2138_v24 = vmin.f32 %v1882_v43, 6.0  ;;  %v2140_v27 = vmin.f32 %v1884_v48, 6.0  ;;  %v1883_v15 = vmax.f32 %v543_v11, 0.0  ;;  %v1885_v30 = vmax.f32 %v704_v12, 0.0  ;;  %1516 = vmatprep.mubr.f32.mxu0 %v2893_v0  ;;  %1677 = vmatprep.mubr.f32.mxu1 %v2893_v0 }
 0x12a   : > { %2379 = vst [vmem:[%s3485_s9 + $0x588] sm:$0xff] %v2123_v19  ;;  %2381 = vst [vmem:[%s3485_s9 + $0x598] sm:$0xff] %v2125_v21  ;;  %v547_v32 = vadd.f32 %v546_v22, %v3665_v18  ;;  %v708_v46 = vadd.f32 %v707_v23, %v3665_v18  ;;  %v548_v33 = vpop.f32.mrf.mxu0  ;;  %v709_v49 = vpop.f32.mrf.mxu1 }
 0x12b   : > { %2394 = vst [vmem:[%s3485_s9 + $0x600] sm:$0xff] %v2138_v24  ;;  %2396 = vst [vmem:[%s3485_s9 + $0x610] sm:$0xff] %v2140_v27  ;;  %v2139_v35 = vmin.f32 %v1883_v15, 6.0  ;;  %v2141_v36 = vmin.f32 %v1885_v30, 6.0  ;;  %v549_v38 = vadd.f32 %v548_v33, %v3665_v18  ;;  %v710_v39 = vadd.f32 %v709_v49, %v3665_v18 }
 0x12c   : > { %v1898_v41 = vmax.f32 %v547_v32, 0.0  ;;  %v1900_v42 = vmax.f32 %v708_v46, 0.0  ;;  %v552_v44 = vpop.f32.mrf.mxu0  ;;  %v713_v45 = vpop.f32.mrf.mxu1  ;;  %2681 = vmatmul.mubr.msk.f32.gmra.mxu0 %vm353_vm0, %v3235_v50  ;;  %2697 = vmatmul.mubr.msk.f32.gmra.mxu1 %vm353_vm0, %v3235_v50 }
 0x12d   : > { %2395 = vst [vmem:[%s3485_s9 + $0x608] sm:$0xff] %v2139_v35  ;;  %2397 = vst [vmem:[%s3485_s9 + $0x618] sm:$0xff] %v2141_v36  ;;  %v1899_v52 = vmax.f32 %v549_v38, 0.0  ;;  %v1901_v20 = vmax.f32 %v710_v39, 0.0  ;;  %v553_v31 = vadd.f32 %v552_v44, %v3673_v37  ;;  %v714_v40 = vadd.f32 %v713_v45, %v3673_v37  ;;  %1522 = vmatprep.mubr.f32.mxu0 %v2893_v0 }
 0x12e   : > { %1683 = vmatprep.mubr.f32.mxu1 %v2893_v0  ;;  %v2154_v47 = vmin.f32 %v1898_v41, 6.0  ;;  %v2156_v57 = vmin.f32 %v1900_v42, 6.0  ;;  %v554_v50 = vpop.f32.mrf.mxu0  ;;  %v715_v58 = vpop.f32.mrf.mxu1 }
 0x12f   : > { %v2155_v59 = vmin.f32 %v1899_v52, 6.0  ;;  %v2157_v60 = vmin.f32 %v1901_v20, 6.0  ;;  %v1914_v61 = vmax.f32 %v553_v31, 0.0  ;;  %v1916_v62 = vmax.f32 %v714_v40, 0.0 }
 0x130   : > { %2410 = vst [vmem:[%s3485_s9 + $0x680] sm:$0xff] %v2154_v47  ;;  %2412 = vst [vmem:[%s3485_s9 + $0x690] sm:$0xff] %v2156_v57  ;;  %v555_v63 = vadd.f32 %v554_v50, %v3673_v37  ;;  %v716_v1 = vadd.f32 %v715_v58, %v3673_v37  ;;  %v558_v0 = vpop.f32.mrf.mxu0  ;;  %v719_v2 = vpop.f32.mrf.mxu1  ;;  %2682 = vmatmul.mubr.msk.f32.gmra.mxu0 %vm353_vm0, %v2778_v4  ;;  %2698 = vmatmul.mubr.msk.f32.gmra.mxu1 %vm353_vm0, %v2778_v4 }
 0x131   : > { %2411 = vst [vmem:[%s3485_s9 + $0x688] sm:$0xff] %v2155_v59  ;;  %2413 = vst [vmem:[%s3485_s9 + $0x698] sm:$0xff] %v2157_v60  ;;  %v2170_v5 = vmin.f32 %v1914_v61, 6.0  ;;  %v2172_v6 = vmin.f32 %v1916_v62, 6.0  ;;  %v559_v7 = vadd.f32 %v558_v0, %v3693_v56  ;;  %v720_v8 = vadd.f32 %v719_v2, %v3693_v56 }
 0x132   : > { %v1915_v9 = vmax.f32 %v555_v63, 0.0  ;;  %v1917_v25 = vmax.f32 %v716_v1, 0.0  ;;  %v560_v34 = vpop.f32.mrf.mxu0  ;;  %v721_v43 = vpop.f32.mrf.mxu1 }
 0x133   : > { %2426 = vst [vmem:[%s3485_s9 + $0x700] sm:$0xff] %v2170_v5  ;;  %2428 = vst [vmem:[%s3485_s9 + $0x710] sm:$0xff] %v2172_v6  ;;  %v1930_v48 = vmax.f32 %v559_v7, 0.0  ;;  %v1932_v11 = vmax.f32 %v720_v8, 0.0  ;;  %v561_v12 = vadd.f32 %v560_v34, %v3693_v56  ;;  %v722_v19 = vadd.f32 %v721_v43, %v3693_v56 }
 0x134   : > { %v2171_v21 = vmin.f32 %v1915_v9, 6.0  ;;  %v2173_v22 = vmin.f32 %v1917_v25, 6.0  ;;  %v790_v23 = vpop.f32.mrf.mxu0  ;;  %v951_v24 = vpop.f32.mrf.mxu1 }
 0x135   : > { %v2186_v27 = vmin.f32 %v1930_v48, 6.0  ;;  %v2188_v15 = vmin.f32 %v1932_v11, 6.0  ;;  %v1931_v30 = vmax.f32 %v561_v12, 0.0  ;;  %v1933_v32 = vmax.f32 %v722_v19, 0.0 }
 0x136   : > { %2427 = vst [vmem:[%s3485_s9 + $0x708] sm:$0xff] %v2171_v21  ;;  %2429 = vst [vmem:[%s3485_s9 + $0x718] sm:$0xff] %v2173_v22  ;;  %v791_v46 = vadd.f32 %v790_v23, %v3460_v3  ;;  %v952_v33 = vadd.f32 %v951_v24, %v3460_v3  ;;  %v792_v49 = vpop.f32.mrf.mxu0  ;;  %v953_v35 = vpop.f32.mrf.mxu1 }
 0x137   : > { %2442 = vst [vmem:[%s3485_s9 + $0x780] sm:$0xff] %v2186_v27  ;;  %2444 = vst [vmem:[%s3485_s9 + $0x790] sm:$0xff] %v2188_v15  ;;  %v2187_v36 = vmin.f32 %v1931_v30, 6.0  ;;  %v2189_v38 = vmin.f32 %v1933_v32, 6.0  ;;  %v793_v39 = vadd.f32 %v792_v49, %v3460_v3  ;;  %v954_v41 = vadd.f32 %v953_v35, %v3460_v3 }
 0x138   : > { %v1694_v42 = vmax.f32 %v791_v46, 0.0  ;;  %v1696_v44 = vmax.f32 %v952_v33, 0.0  ;;  %v796_v45 = vpop.f32.mrf.mxu0  ;;  %v957_v52 = vpop.f32.mrf.mxu1 }
 0x139   : > { %2443 = vst [vmem:[%s3485_s9 + $0x788] sm:$0xff] %v2187_v36  ;;  %2445 = vst [vmem:[%s3485_s9 + $0x798] sm:$0xff] %v2189_v38  ;;  %v1695_v20 = vmax.f32 %v793_v39, 0.0  ;;  %v1697_v31 = vmax.f32 %v954_v41, 0.0  ;;  %v797_v40 = vadd.f32 %v796_v45, %v3473_v16  ;;  %v958_v47 = vadd.f32 %v957_v52, %v3473_v16 }
 0x13a   : > { %v1950_v57 = vmin.f32 %v1694_v42, 6.0  ;;  %v1952_v50 = vmin.f32 %v1696_v44, 6.0  ;;  %v798_v58 = vpop.f32.mrf.mxu0  ;;  %v959_v59 = vpop.f32.mrf.mxu1 }
 0x13b   : > { %v1951_v60 = vmin.f32 %v1695_v20, 6.0  ;;  %v1953_v61 = vmin.f32 %v1697_v31, 6.0  ;;  %v1710_v62 = vmax.f32 %v797_v40, 0.0  ;;  %v1712_v63 = vmax.f32 %v958_v47, 0.0 }
 0x13c   : > { %2206 = vst [vmem:[%s3485_s9 + $0x20] sm:$0xff] %v1950_v57  ;;  %2208 = vst [vmem:[%s3485_s9 + $0x30] sm:$0xff] %v1952_v50  ;;  %v799_v1 = vadd.f32 %v798_v58, %v3473_v16  ;;  %v960_v0 = vadd.f32 %v959_v59, %v3473_v16  ;;  %v802_v2 = vpop.f32.mrf.mxu0  ;;  %v963_v4 = vpop.f32.mrf.mxu1 }
 0x13d   : > { %2207 = vst [vmem:[%s3485_s9 + $0x28] sm:$0xff] %v1951_v60  ;;  %2209 = vst [vmem:[%s3485_s9 + $0x38] sm:$0xff] %v1953_v61  ;;  %v1966_v5 = vmin.f32 %v1710_v62, 6.0  ;;  %v1968_v6 = vmin.f32 %v1712_v63, 6.0  ;;  %v803_v7 = vadd.f32 %v802_v2, %v3475_v10  ;;  %v964_v8 = vadd.f32 %v963_v4, %v3475_v10 }
 0x13e   : > { %v1711_v9 = vmax.f32 %v799_v1, 0.0  ;;  %v1713_v25 = vmax.f32 %v960_v0, 0.0  ;;  %v804_v34 = vpop.f32.mrf.mxu0  ;;  %v965_v43 = vpop.f32.mrf.mxu1 }
 0x13f   : > { %2222 = vst [vmem:[%s3485_s9 + $0xa0] sm:$0xff] %v1966_v5  ;;  %2224 = vst [vmem:[%s3485_s9 + $0xb0] sm:$0xff] %v1968_v6  ;;  %v1726_v48 = vmax.f32 %v803_v7, 0.0  ;;  %v1728_v11 = vmax.f32 %v964_v8, 0.0  ;;  %v805_v12 = vadd.f32 %v804_v34, %v3475_v10  ;;  %v966_v19 = vadd.f32 %v965_v43, %v3475_v10 }
 0x140   : > { %v1967_v21 = vmin.f32 %v1711_v9, 6.0  ;;  %v1969_v22 = vmin.f32 %v1713_v25, 6.0  ;;  %v808_v23 = vpop.f32.mrf.mxu0  ;;  %v969_v24 = vpop.f32.mrf.mxu1 }
 0x141   : > { %v1982_v27 = vmin.f32 %v1726_v48, 6.0  ;;  %v1984_v15 = vmin.f32 %v1728_v11, 6.0  ;;  %v1727_v30 = vmax.f32 %v805_v12, 0.0  ;;  %v1729_v32 = vmax.f32 %v966_v19, 0.0 }
 0x142   : > { %2223 = vst [vmem:[%s3485_s9 + $0xa8] sm:$0xff] %v1967_v21  ;;  %2225 = vst [vmem:[%s3485_s9 + $0xb8] sm:$0xff] %v1969_v22  ;;  %v809_v46 = vadd.f32 %v808_v23, %v3501_v51  ;;  %v970_v33 = vadd.f32 %v969_v24, %v3501_v51  ;;  %v810_v49 = vpop.f32.mrf.mxu0  ;;  %v971_v35 = vpop.f32.mrf.mxu1 }
 0x143   : > { %2238 = vst [vmem:[%s3485_s9 + $0x120] sm:$0xff] %v1982_v27  ;;  %2240 = vst [vmem:[%s3485_s9 + $0x130] sm:$0xff] %v1984_v15  ;;  %v1983_v36 = vmin.f32 %v1727_v30, 6.0  ;;  %v1985_v38 = vmin.f32 %v1729_v32, 6.0  ;;  %v811_v39 = vadd.f32 %v810_v49, %v3501_v51  ;;  %v972_v41 = vadd.f32 %v971_v35, %v3501_v51 }
 0x144   : > { %v1742_v42 = vmax.f32 %v809_v46, 0.0  ;;  %v1744_v44 = vmax.f32 %v970_v33, 0.0  ;;  %v814_v45 = vpop.f32.mrf.mxu0  ;;  %v975_v52 = vpop.f32.mrf.mxu1 }
 0x145   : > { %2239 = vst [vmem:[%s3485_s9 + $0x128] sm:$0xff] %v1983_v36  ;;  %2241 = vst [vmem:[%s3485_s9 + $0x138] sm:$0xff] %v1985_v38  ;;  %v1743_v20 = vmax.f32 %v811_v39, 0.0  ;;  %v1745_v31 = vmax.f32 %v972_v41, 0.0  ;;  %v815_v40 = vadd.f32 %v814_v45, %v3521_v13  ;;  %v976_v47 = vadd.f32 %v975_v52, %v3521_v13 }
 0x146   : > { %v1998_v57 = vmin.f32 %v1742_v42, 6.0  ;;  %v2000_v50 = vmin.f32 %v1744_v44, 6.0  ;;  %v816_v58 = vpop.f32.mrf.mxu0  ;;  %v977_v59 = vpop.f32.mrf.mxu1 }
 0x147   : > { %v1999_v60 = vmin.f32 %v1743_v20, 6.0  ;;  %v2001_v61 = vmin.f32 %v1745_v31, 6.0  ;;  %v1758_v62 = vmax.f32 %v815_v40, 0.0  ;;  %v1760_v63 = vmax.f32 %v976_v47, 0.0 }
 0x148   : > { %2254 = vst [vmem:[%s3485_s9 + $0x1a0] sm:$0xff] %v1998_v57  ;;  %2256 = vst [vmem:[%s3485_s9 + $0x1b0] sm:$0xff] %v2000_v50  ;;  %v817_v1 = vadd.f32 %v816_v58, %v3521_v13  ;;  %v978_v0 = vadd.f32 %v977_v59, %v3521_v13  ;;  %v820_v2 = vpop.f32.mrf.mxu0  ;;  %v981_v4 = vpop.f32.mrf.mxu1 }
 0x149   : > { %2255 = vst [vmem:[%s3485_s9 + $0x1a8] sm:$0xff] %v1999_v60  ;;  %2257 = vst [vmem:[%s3485_s9 + $0x1b8] sm:$0xff] %v2001_v61  ;;  %v2014_v5 = vmin.f32 %v1758_v62, 6.0  ;;  %v2016_v6 = vmin.f32 %v1760_v63, 6.0  ;;  %v821_v7 = vadd.f32 %v820_v2, %v3529_v26  ;;  %v982_v8 = vadd.f32 %v981_v4, %v3529_v26 }
 0x14a   : > { %v1759_v9 = vmax.f32 %v817_v1, 0.0  ;;  %v1761_v25 = vmax.f32 %v978_v0, 0.0  ;;  %v822_v34 = vpop.f32.mrf.mxu0  ;;  %v983_v43 = vpop.f32.mrf.mxu1 }
 0x14b   : > { %2270 = vst [vmem:[%s3485_s9 + $0x220] sm:$0xff] %v2014_v5  ;;  %2272 = vst [vmem:[%s3485_s9 + $0x230] sm:$0xff] %v2016_v6  ;;  %v1774_v48 = vmax.f32 %v821_v7, 0.0  ;;  %v1776_v11 = vmax.f32 %v982_v8, 0.0  ;;  %v823_v12 = vadd.f32 %v822_v34, %v3529_v26  ;;  %v984_v19 = vadd.f32 %v983_v43, %v3529_v26 }
 0x14c   : > { %v2015_v21 = vmin.f32 %v1759_v9, 6.0  ;;  %v2017_v22 = vmin.f32 %v1761_v25, 6.0  ;;  %v826_v23 = vpop.f32.mrf.mxu0  ;;  %v987_v24 = vpop.f32.mrf.mxu1 }
 0x14d   : > { %v2030_v27 = vmin.f32 %v1774_v48, 6.0  ;;  %v2032_v15 = vmin.f32 %v1776_v11, 6.0  ;;  %v1775_v30 = vmax.f32 %v823_v12, 0.0  ;;  %v1777_v32 = vmax.f32 %v984_v19, 0.0 }
 0x14e   : > { %2271 = vst [vmem:[%s3485_s9 + $0x228] sm:$0xff] %v2015_v21  ;;  %2273 = vst [vmem:[%s3485_s9 + $0x238] sm:$0xff] %v2017_v22  ;;  %v827_v46 = vadd.f32 %v826_v23, %v3549_v53  ;;  %v988_v33 = vadd.f32 %v987_v24, %v3549_v53  ;;  %v828_v49 = vpop.f32.mrf.mxu0  ;;  %v989_v35 = vpop.f32.mrf.mxu1 }
 0x14f   : > { %2286 = vst [vmem:[%s3485_s9 + $0x2a0] sm:$0xff] %v2030_v27  ;;  %2288 = vst [vmem:[%s3485_s9 + $0x2b0] sm:$0xff] %v2032_v15  ;;  %v2031_v36 = vmin.f32 %v1775_v30, 6.0  ;;  %v2033_v38 = vmin.f32 %v1777_v32, 6.0  ;;  %v829_v39 = vadd.f32 %v828_v49, %v3549_v53  ;;  %v990_v41 = vadd.f32 %v989_v35, %v3549_v53 }
 0x150   : > { %v1790_v42 = vmax.f32 %v827_v46, 0.0  ;;  %v1792_v44 = vmax.f32 %v988_v33, 0.0  ;;  %v832_v45 = vpop.f32.mrf.mxu0  ;;  %v993_v52 = vpop.f32.mrf.mxu1 }
 0x151   : > { %2287 = vst [vmem:[%s3485_s9 + $0x2a8] sm:$0xff] %v2031_v36  ;;  %2289 = vst [vmem:[%s3485_s9 + $0x2b8] sm:$0xff] %v2033_v38  ;;  %v1791_v20 = vmax.f32 %v829_v39, 0.0  ;;  %v1793_v31 = vmax.f32 %v990_v41, 0.0  ;;  %v833_v40 = vadd.f32 %v832_v45, %v3569_v14  ;;  %v994_v47 = vadd.f32 %v993_v52, %v3569_v14 }
 0x152   : > { %v2046_v57 = vmin.f32 %v1790_v42, 6.0  ;;  %v2048_v50 = vmin.f32 %v1792_v44, 6.0  ;;  %v834_v58 = vpop.f32.mrf.mxu0  ;;  %v995_v59 = vpop.f32.mrf.mxu1 }
 0x153   : > { %v2047_v60 = vmin.f32 %v1791_v20, 6.0  ;;  %v2049_v61 = vmin.f32 %v1793_v31, 6.0  ;;  %v1806_v62 = vmax.f32 %v833_v40, 0.0  ;;  %v1808_v63 = vmax.f32 %v994_v47, 0.0 }
 0x154   : > { %2302 = vst [vmem:[%s3485_s9 + $0x320] sm:$0xff] %v2046_v57  ;;  %2304 = vst [vmem:[%s3485_s9 + $0x330] sm:$0xff] %v2048_v50  ;;  %v835_v1 = vadd.f32 %v834_v58, %v3569_v14  ;;  %v996_v0 = vadd.f32 %v995_v59, %v3569_v14  ;;  %v838_v2 = vpop.f32.mrf.mxu0  ;;  %v999_v4 = vpop.f32.mrf.mxu1 }
 0x155   : > { %2303 = vst [vmem:[%s3485_s9 + $0x328] sm:$0xff] %v2047_v60  ;;  %2305 = vst [vmem:[%s3485_s9 + $0x338] sm:$0xff] %v2049_v61  ;;  %v2062_v5 = vmin.f32 %v1806_v62, 6.0  ;;  %v2064_v6 = vmin.f32 %v1808_v63, 6.0  ;;  %v839_v7 = vadd.f32 %v838_v2, %v3577_v29  ;;  %v1000_v8 = vadd.f32 %v999_v4, %v3577_v29 }
 0x156   : > { %v1807_v9 = vmax.f32 %v835_v1, 0.0  ;;  %v1809_v25 = vmax.f32 %v996_v0, 0.0  ;;  %v840_v34 = vpop.f32.mrf.mxu0  ;;  %v1001_v43 = vpop.f32.mrf.mxu1 }
 0x157   : > { %2318 = vst [vmem:[%s3485_s9 + $0x3a0] sm:$0xff] %v2062_v5  ;;  %2320 = vst [vmem:[%s3485_s9 + $0x3b0] sm:$0xff] %v2064_v6  ;;  %v1822_v48 = vmax.f32 %v839_v7, 0.0  ;;  %v1824_v11 = vmax.f32 %v1000_v8, 0.0  ;;  %v841_v12 = vadd.f32 %v840_v34, %v3577_v29  ;;  %v1002_v19 = vadd.f32 %v1001_v43, %v3577_v29 }
 0x158   : > { %v2063_v21 = vmin.f32 %v1807_v9, 6.0  ;;  %v2065_v22 = vmin.f32 %v1809_v25, 6.0  ;;  %v844_v23 = vpop.f32.mrf.mxu0  ;;  %v1005_v24 = vpop.f32.mrf.mxu1 }
 0x159   : > { %v2078_v27 = vmin.f32 %v1822_v48, 6.0  ;;  %v2080_v15 = vmin.f32 %v1824_v11, 6.0  ;;  %v1823_v30 = vmax.f32 %v841_v12, 0.0  ;;  %v1825_v32 = vmax.f32 %v1002_v19, 0.0 }
 0x15a   : > { %2319 = vst [vmem:[%s3485_s9 + $0x3a8] sm:$0xff] %v2063_v21  ;;  %2321 = vst [vmem:[%s3485_s9 + $0x3b8] sm:$0xff] %v2065_v22  ;;  %v845_v46 = vadd.f32 %v844_v23, %v3597_v54  ;;  %v1006_v33 = vadd.f32 %v1005_v24, %v3597_v54  ;;  %v846_v49 = vpop.f32.mrf.mxu0  ;;  %v1007_v35 = vpop.f32.mrf.mxu1 }
 0x15b   : > { %2334 = vst [vmem:[%s3485_s9 + $0x420] sm:$0xff] %v2078_v27  ;;  %2336 = vst [vmem:[%s3485_s9 + $0x430] sm:$0xff] %v2080_v15  ;;  %v2079_v36 = vmin.f32 %v1823_v30, 6.0  ;;  %v2081_v38 = vmin.f32 %v1825_v32, 6.0  ;;  %v847_v39 = vadd.f32 %v846_v49, %v3597_v54  ;;  %v1008_v41 = vadd.f32 %v1007_v35, %v3597_v54 }
 0x15c   : > { %v1838_v42 = vmax.f32 %v845_v46, 0.0  ;;  %v1840_v44 = vmax.f32 %v1006_v33, 0.0  ;;  %v850_v45 = vpop.f32.mrf.mxu0  ;;  %v1011_v52 = vpop.f32.mrf.mxu1 }
 0x15d   : > { %2335 = vst [vmem:[%s3485_s9 + $0x428] sm:$0xff] %v2079_v36  ;;  %2337 = vst [vmem:[%s3485_s9 + $0x438] sm:$0xff] %v2081_v38  ;;  %v1839_v20 = vmax.f32 %v847_v39, 0.0  ;;  %v1841_v31 = vmax.f32 %v1008_v41, 0.0  ;;  %v851_v40 = vadd.f32 %v850_v45, %v3617_v17  ;;  %v1012_v47 = vadd.f32 %v1011_v52, %v3617_v17 }
 0x15e   : > { %v2094_v57 = vmin.f32 %v1838_v42, 6.0  ;;  %v2096_v50 = vmin.f32 %v1840_v44, 6.0  ;;  %v852_v58 = vpop.f32.mrf.mxu0  ;;  %v1013_v59 = vpop.f32.mrf.mxu1 }
 0x15f   : > { %v2095_v60 = vmin.f32 %v1839_v20, 6.0  ;;  %v2097_v61 = vmin.f32 %v1841_v31, 6.0  ;;  %v1854_v62 = vmax.f32 %v851_v40, 0.0  ;;  %v1856_v63 = vmax.f32 %v1012_v47, 0.0 }
 0x160   : > { %2350 = vst [vmem:[%s3485_s9 + $0x4a0] sm:$0xff] %v2094_v57  ;;  %2352 = vst [vmem:[%s3485_s9 + $0x4b0] sm:$0xff] %v2096_v50  ;;  %v853_v1 = vadd.f32 %v852_v58, %v3617_v17  ;;  %v1014_v0 = vadd.f32 %v1013_v59, %v3617_v17  ;;  %v856_v2 = vpop.f32.mrf.mxu0  ;;  %v1017_v4 = vpop.f32.mrf.mxu1 }
 0x161   : > { %2351 = vst [vmem:[%s3485_s9 + $0x4a8] sm:$0xff] %v2095_v60  ;;  %2353 = vst [vmem:[%s3485_s9 + $0x4b8] sm:$0xff] %v2097_v61  ;;  %v2110_v5 = vmin.f32 %v1854_v62, 6.0  ;;  %v2112_v6 = vmin.f32 %v1856_v63, 6.0  ;;  %v857_v7 = vadd.f32 %v856_v2, %v3625_v28  ;;  %v1018_v8 = vadd.f32 %v1017_v4, %v3625_v28 }
 0x162   : > { %v1855_v9 = vmax.f32 %v853_v1, 0.0  ;;  %v1857_v25 = vmax.f32 %v1014_v0, 0.0  ;;  %v858_v34 = vpop.f32.mrf.mxu0  ;;  %v1019_v43 = vpop.f32.mrf.mxu1 }
 0x163   : > { %2366 = vst [vmem:[%s3485_s9 + $0x520] sm:$0xff] %v2110_v5  ;;  %2368 = vst [vmem:[%s3485_s9 + $0x530] sm:$0xff] %v2112_v6  ;;  %v1870_v48 = vmax.f32 %v857_v7, 0.0  ;;  %v1872_v11 = vmax.f32 %v1018_v8, 0.0  ;;  %v859_v12 = vadd.f32 %v858_v34, %v3625_v28  ;;  %v1020_v19 = vadd.f32 %v1019_v43, %v3625_v28 }
 0x164   : > { %v2111_v21 = vmin.f32 %v1855_v9, 6.0  ;;  %v2113_v22 = vmin.f32 %v1857_v25, 6.0  ;;  %v862_v23 = vpop.f32.mrf.mxu0  ;;  %v1023_v24 = vpop.f32.mrf.mxu1 }
 0x165   : > { %v2126_v27 = vmin.f32 %v1870_v48, 6.0  ;;  %v2128_v15 = vmin.f32 %v1872_v11, 6.0  ;;  %v1871_v30 = vmax.f32 %v859_v12, 0.0  ;;  %v1873_v32 = vmax.f32 %v1020_v19, 0.0 }
 0x166   : > { %2367 = vst [vmem:[%s3485_s9 + $0x528] sm:$0xff] %v2111_v21  ;;  %2369 = vst [vmem:[%s3485_s9 + $0x538] sm:$0xff] %v2113_v22  ;;  %v863_v46 = vadd.f32 %v862_v23, %v3645_v55  ;;  %v1024_v33 = vadd.f32 %v1023_v24, %v3645_v55  ;;  %v864_v49 = vpop.f32.mrf.mxu0  ;;  %v1025_v35 = vpop.f32.mrf.mxu1 }
 0x167   : > { %2382 = vst [vmem:[%s3485_s9 + $0x5a0] sm:$0xff] %v2126_v27  ;;  %2384 = vst [vmem:[%s3485_s9 + $0x5b0] sm:$0xff] %v2128_v15  ;;  %v2127_v36 = vmin.f32 %v1871_v30, 6.0  ;;  %v2129_v38 = vmin.f32 %v1873_v32, 6.0  ;;  %v865_v39 = vadd.f32 %v864_v49, %v3645_v55  ;;  %v1026_v41 = vadd.f32 %v1025_v35, %v3645_v55 }
 0x168   : > { %v1886_v42 = vmax.f32 %v863_v46, 0.0  ;;  %v1888_v44 = vmax.f32 %v1024_v33, 0.0  ;;  %v868_v45 = vpop.f32.mrf.mxu0  ;;  %v1029_v52 = vpop.f32.mrf.mxu1 }
 0x169   : > { %2383 = vst [vmem:[%s3485_s9 + $0x5a8] sm:$0xff] %v2127_v36  ;;  %2385 = vst [vmem:[%s3485_s9 + $0x5b8] sm:$0xff] %v2129_v38  ;;  %v1887_v20 = vmax.f32 %v865_v39, 0.0  ;;  %v1889_v31 = vmax.f32 %v1026_v41, 0.0  ;;  %v869_v40 = vadd.f32 %v868_v45, %v3665_v18  ;;  %v1030_v47 = vadd.f32 %v1029_v52, %v3665_v18 }
 0x16a   : > { %v2142_v57 = vmin.f32 %v1886_v42, 6.0  ;;  %v2144_v50 = vmin.f32 %v1888_v44, 6.0  ;;  %v870_v58 = vpop.f32.mrf.mxu0  ;;  %v1031_v59 = vpop.f32.mrf.mxu1 }
 0x16b   : > { %v2143_v60 = vmin.f32 %v1887_v20, 6.0  ;;  %v2145_v61 = vmin.f32 %v1889_v31, 6.0  ;;  %v1902_v62 = vmax.f32 %v869_v40, 0.0  ;;  %v1904_v63 = vmax.f32 %v1030_v47, 0.0 }
 0x16c   : > { %2398 = vst [vmem:[%s3485_s9 + $0x620] sm:$0xff] %v2142_v57  ;;  %2400 = vst [vmem:[%s3485_s9 + $0x630] sm:$0xff] %v2144_v50  ;;  %v871_v1 = vadd.f32 %v870_v58, %v3665_v18  ;;  %v1032_v0 = vadd.f32 %v1031_v59, %v3665_v18  ;;  %v874_v2 = vpop.f32.mrf.mxu0  ;;  %v1035_v4 = vpop.f32.mrf.mxu1 }
 0x16d   : > { %2399 = vst [vmem:[%s3485_s9 + $0x628] sm:$0xff] %v2143_v60  ;;  %2401 = vst [vmem:[%s3485_s9 + $0x638] sm:$0xff] %v2145_v61  ;;  %v2158_v5 = vmin.f32 %v1902_v62, 6.0  ;;  %v2160_v6 = vmin.f32 %v1904_v63, 6.0  ;;  %v875_v7 = vadd.f32 %v874_v2, %v3673_v37  ;;  %v1036_v8 = vadd.f32 %v1035_v4, %v3673_v37 }
 0x16e   : > { %v1903_v9 = vmax.f32 %v871_v1, 0.0  ;;  %v1905_v25 = vmax.f32 %v1032_v0, 0.0  ;;  %v876_v34 = vpop.f32.mrf.mxu0  ;;  %v1037_v43 = vpop.f32.mrf.mxu1 }
 0x16f   : > { %2414 = vst [vmem:[%s3485_s9 + $0x6a0] sm:$0xff] %v2158_v5  ;;  %2416 = vst [vmem:[%s3485_s9 + $0x6b0] sm:$0xff] %v2160_v6  ;;  %v1918_v48 = vmax.f32 %v875_v7, 0.0  ;;  %v1920_v11 = vmax.f32 %v1036_v8, 0.0  ;;  %v877_v12 = vadd.f32 %v876_v34, %v3673_v37  ;;  %v1038_v19 = vadd.f32 %v1037_v43, %v3673_v37 }
 0x170   : > { %v2159_v21 = vmin.f32 %v1903_v9, 6.0  ;;  %v2161_v22 = vmin.f32 %v1905_v25, 6.0  ;;  %v880_v23 = vpop.f32.mrf.mxu0  ;;  %v1041_v24 = vpop.f32.mrf.mxu1 }
 0x171   : > { %v2174_v27 = vmin.f32 %v1918_v48, 6.0  ;;  %v2176_v15 = vmin.f32 %v1920_v11, 6.0  ;;  %v1919_v30 = vmax.f32 %v877_v12, 0.0  ;;  %v1921_v32 = vmax.f32 %v1038_v19, 0.0 }
 0x172   : > { %2415 = vst [vmem:[%s3485_s9 + $0x6a8] sm:$0xff] %v2159_v21  ;;  %2417 = vst [vmem:[%s3485_s9 + $0x6b8] sm:$0xff] %v2161_v22  ;;  %v881_v46 = vadd.f32 %v880_v23, %v3693_v56  ;;  %v1042_v33 = vadd.f32 %v1041_v24, %v3693_v56  ;;  %v882_v49 = vpop.f32.mrf.mxu0  ;;  %v1043_v35 = vpop.f32.mrf.mxu1 }
 0x173   : > { %2430 = vst [vmem:[%s3485_s9 + $0x720] sm:$0xff] %v2174_v27  ;;  %2432 = vst [vmem:[%s3485_s9 + $0x730] sm:$0xff] %v2176_v15  ;;  %v2175_v36 = vmin.f32 %v1919_v30, 6.0  ;;  %v2177_v38 = vmin.f32 %v1921_v32, 6.0  ;;  %v883_v39 = vadd.f32 %v882_v49, %v3693_v56  ;;  %v1044_v41 = vadd.f32 %v1043_v35, %v3693_v56 }
 0x174   : > { %v1934_v42 = vmax.f32 %v881_v46, 0.0  ;;  %v1936_v44 = vmax.f32 %v1042_v33, 0.0  ;;  %v1112_v45 = vpop.f32.mrf.mxu0  ;;  %v1273_v52 = vpop.f32.mrf.mxu1 }
 0x175   : > { %2431 = vst [vmem:[%s3485_s9 + $0x728] sm:$0xff] %v2175_v36  ;;  %2433 = vst [vmem:[%s3485_s9 + $0x738] sm:$0xff] %v2177_v38  ;;  %v1935_v20 = vmax.f32 %v883_v39, 0.0  ;;  %v1937_v31 = vmax.f32 %v1044_v41, 0.0  ;;  %v1113_v40 = vadd.f32 %v1112_v45, %v3460_v3  ;;  %v1274_v47 = vadd.f32 %v1273_v52, %v3460_v3 }
 0x176   : > { %v2190_v57 = vmin.f32 %v1934_v42, 6.0  ;;  %v2192_v50 = vmin.f32 %v1936_v44, 6.0  ;;  %v1114_v58 = vpop.f32.mrf.mxu0  ;;  %v1275_v59 = vpop.f32.mrf.mxu1 }
 0x177   : > { %v2191_v60 = vmin.f32 %v1935_v20, 6.0  ;;  %v2193_v61 = vmin.f32 %v1937_v31, 6.0  ;;  %v1698_v62 = vmax.f32 %v1113_v40, 0.0  ;;  %v1700_v63 = vmax.f32 %v1274_v47, 0.0 }
 0x178   : > { %2446 = vst [vmem:[%s3485_s9 + $0x7a0] sm:$0xff] %v2190_v57  ;;  %2448 = vst [vmem:[%s3485_s9 + $0x7b0] sm:$0xff] %v2192_v50  ;;  %v1115_v1 = vadd.f32 %v1114_v58, %v3460_v3  ;;  %v1276_v0 = vadd.f32 %v1275_v59, %v3460_v3  ;;  %v1118_v2 = vpop.f32.mrf.mxu0  ;;  %v1279_v4 = vpop.f32.mrf.mxu1 }
 0x179   : > { %2447 = vst [vmem:[%s3485_s9 + $0x7a8] sm:$0xff] %v2191_v60  ;;  %2449 = vst [vmem:[%s3485_s9 + $0x7b8] sm:$0xff] %v2193_v61  ;;  %v1954_v5 = vmin.f32 %v1698_v62, 6.0  ;;  %v1956_v6 = vmin.f32 %v1700_v63, 6.0  ;;  %v1119_v7 = vadd.f32 %v1118_v2, %v3473_v16  ;;  %v1280_v8 = vadd.f32 %v1279_v4, %v3473_v16 }
 0x17a   : > { %v1699_v9 = vmax.f32 %v1115_v1, 0.0  ;;  %v1701_v25 = vmax.f32 %v1276_v0, 0.0  ;;  %v1120_v34 = vpop.f32.mrf.mxu0  ;;  %v1281_v43 = vpop.f32.mrf.mxu1 }
 0x17b   : > { %2210 = vst [vmem:[%s3485_s9 + $0x40] sm:$0xff] %v1954_v5  ;;  %2212 = vst [vmem:[%s3485_s9 + $0x50] sm:$0xff] %v1956_v6  ;;  %v1714_v48 = vmax.f32 %v1119_v7, 0.0  ;;  %v1716_v11 = vmax.f32 %v1280_v8, 0.0  ;;  %v1121_v12 = vadd.f32 %v1120_v34, %v3473_v16  ;;  %v1282_v19 = vadd.f32 %v1281_v43, %v3473_v16 }
 0x17c   : > { %v1955_v21 = vmin.f32 %v1699_v9, 6.0  ;;  %v1957_v22 = vmin.f32 %v1701_v25, 6.0  ;;  %v1124_v23 = vpop.f32.mrf.mxu0  ;;  %v1285_v24 = vpop.f32.mrf.mxu1 }
 0x17d   : > { %v1970_v27 = vmin.f32 %v1714_v48, 6.0  ;;  %v1972_v15 = vmin.f32 %v1716_v11, 6.0  ;;  %v1715_v30 = vmax.f32 %v1121_v12, 0.0  ;;  %v1717_v32 = vmax.f32 %v1282_v19, 0.0 }
 0x17e   : > { %2211 = vst [vmem:[%s3485_s9 + $0x48] sm:$0xff] %v1955_v21  ;;  %2213 = vst [vmem:[%s3485_s9 + $0x58] sm:$0xff] %v1957_v22  ;;  %v1125_v46 = vadd.f32 %v1124_v23, %v3475_v10  ;;  %v1286_v33 = vadd.f32 %v1285_v24, %v3475_v10  ;;  %v1126_v49 = vpop.f32.mrf.mxu0  ;;  %v1287_v35 = vpop.f32.mrf.mxu1 }
 0x17f   : > { %2226 = vst [vmem:[%s3485_s9 + $0xc0] sm:$0xff] %v1970_v27  ;;  %2228 = vst [vmem:[%s3485_s9 + $0xd0] sm:$0xff] %v1972_v15  ;;  %v1971_v36 = vmin.f32 %v1715_v30, 6.0  ;;  %v1973_v38 = vmin.f32 %v1717_v32, 6.0  ;;  %v1127_v39 = vadd.f32 %v1126_v49, %v3475_v10  ;;  %v1288_v41 = vadd.f32 %v1287_v35, %v3475_v10 }
 0x180   : > { %v1730_v42 = vmax.f32 %v1125_v46, 0.0  ;;  %v1732_v44 = vmax.f32 %v1286_v33, 0.0  ;;  %v1130_v45 = vpop.f32.mrf.mxu0  ;;  %v1291_v52 = vpop.f32.mrf.mxu1 }
 0x181   : > { %2227 = vst [vmem:[%s3485_s9 + $0xc8] sm:$0xff] %v1971_v36  ;;  %2229 = vst [vmem:[%s3485_s9 + $0xd8] sm:$0xff] %v1973_v38  ;;  %v1731_v20 = vmax.f32 %v1127_v39, 0.0  ;;  %v1733_v31 = vmax.f32 %v1288_v41, 0.0  ;;  %v1131_v40 = vadd.f32 %v1130_v45, %v3501_v51  ;;  %v1292_v47 = vadd.f32 %v1291_v52, %v3501_v51 }
 0x182   : > { %v1986_v57 = vmin.f32 %v1730_v42, 6.0  ;;  %v1988_v50 = vmin.f32 %v1732_v44, 6.0  ;;  %v1132_v58 = vpop.f32.mrf.mxu0  ;;  %v1293_v59 = vpop.f32.mrf.mxu1 }
 0x183   : > { %v1987_v60 = vmin.f32 %v1731_v20, 6.0  ;;  %v1989_v61 = vmin.f32 %v1733_v31, 6.0  ;;  %v1746_v62 = vmax.f32 %v1131_v40, 0.0  ;;  %v1748_v63 = vmax.f32 %v1292_v47, 0.0 }
 0x184   : > { %2242 = vst [vmem:[%s3485_s9 + $0x140] sm:$0xff] %v1986_v57  ;;  %2244 = vst [vmem:[%s3485_s9 + $0x150] sm:$0xff] %v1988_v50  ;;  %v1133_v1 = vadd.f32 %v1132_v58, %v3501_v51  ;;  %v1294_v0 = vadd.f32 %v1293_v59, %v3501_v51  ;;  %v1136_v2 = vpop.f32.mrf.mxu0  ;;  %v1297_v4 = vpop.f32.mrf.mxu1 }
 0x185   : > { %2243 = vst [vmem:[%s3485_s9 + $0x148] sm:$0xff] %v1987_v60  ;;  %2245 = vst [vmem:[%s3485_s9 + $0x158] sm:$0xff] %v1989_v61  ;;  %v2002_v5 = vmin.f32 %v1746_v62, 6.0  ;;  %v2004_v6 = vmin.f32 %v1748_v63, 6.0  ;;  %v1137_v7 = vadd.f32 %v1136_v2, %v3521_v13  ;;  %v1298_v8 = vadd.f32 %v1297_v4, %v3521_v13 }
 0x186   : > { %v1747_v9 = vmax.f32 %v1133_v1, 0.0  ;;  %v1749_v25 = vmax.f32 %v1294_v0, 0.0  ;;  %v1138_v34 = vpop.f32.mrf.mxu0  ;;  %v1299_v43 = vpop.f32.mrf.mxu1 }
 0x187   : > { %2258 = vst [vmem:[%s3485_s9 + $0x1c0] sm:$0xff] %v2002_v5  ;;  %2260 = vst [vmem:[%s3485_s9 + $0x1d0] sm:$0xff] %v2004_v6  ;;  %v1762_v48 = vmax.f32 %v1137_v7, 0.0  ;;  %v1764_v11 = vmax.f32 %v1298_v8, 0.0  ;;  %v1139_v12 = vadd.f32 %v1138_v34, %v3521_v13  ;;  %v1300_v19 = vadd.f32 %v1299_v43, %v3521_v13 }
 0x188   : > { %v2003_v21 = vmin.f32 %v1747_v9, 6.0  ;;  %v2005_v22 = vmin.f32 %v1749_v25, 6.0  ;;  %v1142_v23 = vpop.f32.mrf.mxu0  ;;  %v1303_v24 = vpop.f32.mrf.mxu1 }
 0x189   : > { %v2018_v27 = vmin.f32 %v1762_v48, 6.0  ;;  %v2020_v15 = vmin.f32 %v1764_v11, 6.0  ;;  %v1763_v30 = vmax.f32 %v1139_v12, 0.0  ;;  %v1765_v32 = vmax.f32 %v1300_v19, 0.0 }
 0x18a   : > { %2259 = vst [vmem:[%s3485_s9 + $0x1c8] sm:$0xff] %v2003_v21  ;;  %2261 = vst [vmem:[%s3485_s9 + $0x1d8] sm:$0xff] %v2005_v22  ;;  %v1143_v46 = vadd.f32 %v1142_v23, %v3529_v26  ;;  %v1304_v33 = vadd.f32 %v1303_v24, %v3529_v26  ;;  %v1144_v49 = vpop.f32.mrf.mxu0  ;;  %v1305_v35 = vpop.f32.mrf.mxu1 }
 0x18b   : > { %2274 = vst [vmem:[%s3485_s9 + $0x240] sm:$0xff] %v2018_v27  ;;  %2276 = vst [vmem:[%s3485_s9 + $0x250] sm:$0xff] %v2020_v15  ;;  %v2019_v36 = vmin.f32 %v1763_v30, 6.0  ;;  %v2021_v38 = vmin.f32 %v1765_v32, 6.0  ;;  %v1145_v39 = vadd.f32 %v1144_v49, %v3529_v26  ;;  %v1306_v41 = vadd.f32 %v1305_v35, %v3529_v26 }
 0x18c   : > { %v1778_v42 = vmax.f32 %v1143_v46, 0.0  ;;  %v1780_v44 = vmax.f32 %v1304_v33, 0.0  ;;  %v1148_v45 = vpop.f32.mrf.mxu0  ;;  %v1309_v52 = vpop.f32.mrf.mxu1 }
 0x18d   : > { %2275 = vst [vmem:[%s3485_s9 + $0x248] sm:$0xff] %v2019_v36  ;;  %2277 = vst [vmem:[%s3485_s9 + $0x258] sm:$0xff] %v2021_v38  ;;  %v1779_v20 = vmax.f32 %v1145_v39, 0.0  ;;  %v1781_v31 = vmax.f32 %v1306_v41, 0.0  ;;  %v1149_v40 = vadd.f32 %v1148_v45, %v3549_v53  ;;  %v1310_v47 = vadd.f32 %v1309_v52, %v3549_v53 }
 0x18e   : > { %v2034_v57 = vmin.f32 %v1778_v42, 6.0  ;;  %v2036_v50 = vmin.f32 %v1780_v44, 6.0  ;;  %v1150_v58 = vpop.f32.mrf.mxu0  ;;  %v1311_v59 = vpop.f32.mrf.mxu1 }
 0x18f   : > { %v2035_v60 = vmin.f32 %v1779_v20, 6.0  ;;  %v2037_v61 = vmin.f32 %v1781_v31, 6.0  ;;  %v1794_v62 = vmax.f32 %v1149_v40, 0.0  ;;  %v1796_v63 = vmax.f32 %v1310_v47, 0.0 }
 0x190   : > { %2290 = vst [vmem:[%s3485_s9 + $0x2c0] sm:$0xff] %v2034_v57  ;;  %2292 = vst [vmem:[%s3485_s9 + $0x2d0] sm:$0xff] %v2036_v50  ;;  %v1151_v1 = vadd.f32 %v1150_v58, %v3549_v53  ;;  %v1312_v0 = vadd.f32 %v1311_v59, %v3549_v53  ;;  %v1154_v2 = vpop.f32.mrf.mxu0  ;;  %v1315_v4 = vpop.f32.mrf.mxu1 }
 0x191   : > { %2291 = vst [vmem:[%s3485_s9 + $0x2c8] sm:$0xff] %v2035_v60  ;;  %2293 = vst [vmem:[%s3485_s9 + $0x2d8] sm:$0xff] %v2037_v61  ;;  %v2050_v5 = vmin.f32 %v1794_v62, 6.0  ;;  %v2052_v6 = vmin.f32 %v1796_v63, 6.0  ;;  %v1155_v7 = vadd.f32 %v1154_v2, %v3569_v14  ;;  %v1316_v8 = vadd.f32 %v1315_v4, %v3569_v14 }
 0x192   : > { %v1795_v9 = vmax.f32 %v1151_v1, 0.0  ;;  %v1797_v25 = vmax.f32 %v1312_v0, 0.0  ;;  %v1156_v34 = vpop.f32.mrf.mxu0  ;;  %v1317_v43 = vpop.f32.mrf.mxu1 }
 0x193   : > { %2306 = vst [vmem:[%s3485_s9 + $0x340] sm:$0xff] %v2050_v5  ;;  %2308 = vst [vmem:[%s3485_s9 + $0x350] sm:$0xff] %v2052_v6  ;;  %v1810_v48 = vmax.f32 %v1155_v7, 0.0  ;;  %v1812_v11 = vmax.f32 %v1316_v8, 0.0  ;;  %v1157_v12 = vadd.f32 %v1156_v34, %v3569_v14  ;;  %v1318_v19 = vadd.f32 %v1317_v43, %v3569_v14 }
 0x194   : > { %v2051_v21 = vmin.f32 %v1795_v9, 6.0  ;;  %v2053_v22 = vmin.f32 %v1797_v25, 6.0  ;;  %v1160_v23 = vpop.f32.mrf.mxu0  ;;  %v1321_v24 = vpop.f32.mrf.mxu1 }
 0x195   : > { %v2066_v27 = vmin.f32 %v1810_v48, 6.0  ;;  %v2068_v15 = vmin.f32 %v1812_v11, 6.0  ;;  %v1811_v30 = vmax.f32 %v1157_v12, 0.0  ;;  %v1813_v32 = vmax.f32 %v1318_v19, 0.0 }
 0x196   : > { %2307 = vst [vmem:[%s3485_s9 + $0x348] sm:$0xff] %v2051_v21  ;;  %2309 = vst [vmem:[%s3485_s9 + $0x358] sm:$0xff] %v2053_v22  ;;  %v1161_v46 = vadd.f32 %v1160_v23, %v3577_v29  ;;  %v1322_v33 = vadd.f32 %v1321_v24, %v3577_v29  ;;  %v1162_v49 = vpop.f32.mrf.mxu0  ;;  %v1323_v35 = vpop.f32.mrf.mxu1 }
 0x197   : > { %2322 = vst [vmem:[%s3485_s9 + $0x3c0] sm:$0xff] %v2066_v27  ;;  %2324 = vst [vmem:[%s3485_s9 + $0x3d0] sm:$0xff] %v2068_v15  ;;  %v2067_v36 = vmin.f32 %v1811_v30, 6.0  ;;  %v2069_v38 = vmin.f32 %v1813_v32, 6.0  ;;  %v1163_v39 = vadd.f32 %v1162_v49, %v3577_v29  ;;  %v1324_v41 = vadd.f32 %v1323_v35, %v3577_v29 }
 0x198   : > { %v1826_v42 = vmax.f32 %v1161_v46, 0.0  ;;  %v1828_v44 = vmax.f32 %v1322_v33, 0.0  ;;  %v1166_v45 = vpop.f32.mrf.mxu0  ;;  %v1327_v52 = vpop.f32.mrf.mxu1 }
 0x199   : > { %2323 = vst [vmem:[%s3485_s9 + $0x3c8] sm:$0xff] %v2067_v36  ;;  %2325 = vst [vmem:[%s3485_s9 + $0x3d8] sm:$0xff] %v2069_v38  ;;  %v1827_v20 = vmax.f32 %v1163_v39, 0.0  ;;  %v1829_v31 = vmax.f32 %v1324_v41, 0.0  ;;  %v1167_v40 = vadd.f32 %v1166_v45, %v3597_v54  ;;  %v1328_v47 = vadd.f32 %v1327_v52, %v3597_v54 }
 0x19a   : > { %v2082_v57 = vmin.f32 %v1826_v42, 6.0  ;;  %v2084_v50 = vmin.f32 %v1828_v44, 6.0  ;;  %v1168_v58 = vpop.f32.mrf.mxu0  ;;  %v1329_v59 = vpop.f32.mrf.mxu1 }
 0x19b   : > { %v2083_v60 = vmin.f32 %v1827_v20, 6.0  ;;  %v2085_v61 = vmin.f32 %v1829_v31, 6.0  ;;  %v1842_v62 = vmax.f32 %v1167_v40, 0.0  ;;  %v1844_v63 = vmax.f32 %v1328_v47, 0.0 }
 0x19c   : > { %2338 = vst [vmem:[%s3485_s9 + $0x440] sm:$0xff] %v2082_v57  ;;  %2340 = vst [vmem:[%s3485_s9 + $0x450] sm:$0xff] %v2084_v50  ;;  %v1169_v1 = vadd.f32 %v1168_v58, %v3597_v54  ;;  %v1330_v0 = vadd.f32 %v1329_v59, %v3597_v54  ;;  %v1172_v2 = vpop.f32.mrf.mxu0  ;;  %v1333_v4 = vpop.f32.mrf.mxu1 }
 0x19d   : > { %2339 = vst [vmem:[%s3485_s9 + $0x448] sm:$0xff] %v2083_v60  ;;  %2341 = vst [vmem:[%s3485_s9 + $0x458] sm:$0xff] %v2085_v61  ;;  %v2098_v5 = vmin.f32 %v1842_v62, 6.0  ;;  %v2100_v6 = vmin.f32 %v1844_v63, 6.0  ;;  %v1173_v7 = vadd.f32 %v1172_v2, %v3617_v17  ;;  %v1334_v8 = vadd.f32 %v1333_v4, %v3617_v17 }
 0x19e   : > { %v1843_v9 = vmax.f32 %v1169_v1, 0.0  ;;  %v1845_v25 = vmax.f32 %v1330_v0, 0.0  ;;  %v1174_v34 = vpop.f32.mrf.mxu0  ;;  %v1335_v43 = vpop.f32.mrf.mxu1 }
 0x19f   : > { %2354 = vst [vmem:[%s3485_s9 + $0x4c0] sm:$0xff] %v2098_v5  ;;  %2356 = vst [vmem:[%s3485_s9 + $0x4d0] sm:$0xff] %v2100_v6  ;;  %v1858_v48 = vmax.f32 %v1173_v7, 0.0  ;;  %v1860_v11 = vmax.f32 %v1334_v8, 0.0  ;;  %v1175_v12 = vadd.f32 %v1174_v34, %v3617_v17  ;;  %v1336_v19 = vadd.f32 %v1335_v43, %v3617_v17 }
 0x1a0   : > { %v2099_v21 = vmin.f32 %v1843_v9, 6.0  ;;  %v2101_v22 = vmin.f32 %v1845_v25, 6.0  ;;  %v1178_v23 = vpop.f32.mrf.mxu0  ;;  %v1339_v24 = vpop.f32.mrf.mxu1 }
 0x1a1   : > { %v2114_v27 = vmin.f32 %v1858_v48, 6.0  ;;  %v2116_v15 = vmin.f32 %v1860_v11, 6.0  ;;  %v1859_v30 = vmax.f32 %v1175_v12, 0.0  ;;  %v1861_v32 = vmax.f32 %v1336_v19, 0.0 }
 0x1a2   : > { %2355 = vst [vmem:[%s3485_s9 + $0x4c8] sm:$0xff] %v2099_v21  ;;  %2357 = vst [vmem:[%s3485_s9 + $0x4d8] sm:$0xff] %v2101_v22  ;;  %v1179_v46 = vadd.f32 %v1178_v23, %v3625_v28  ;;  %v1340_v33 = vadd.f32 %v1339_v24, %v3625_v28  ;;  %v1180_v49 = vpop.f32.mrf.mxu0  ;;  %v1341_v35 = vpop.f32.mrf.mxu1 }
 0x1a3   : > { %2370 = vst [vmem:[%s3485_s9 + $0x540] sm:$0xff] %v2114_v27  ;;  %2372 = vst [vmem:[%s3485_s9 + $0x550] sm:$0xff] %v2116_v15  ;;  %v2115_v36 = vmin.f32 %v1859_v30, 6.0  ;;  %v2117_v38 = vmin.f32 %v1861_v32, 6.0  ;;  %v1181_v39 = vadd.f32 %v1180_v49, %v3625_v28  ;;  %v1342_v41 = vadd.f32 %v1341_v35, %v3625_v28 }
 0x1a4   : > { %v1874_v42 = vmax.f32 %v1179_v46, 0.0  ;;  %v1876_v44 = vmax.f32 %v1340_v33, 0.0  ;;  %v1184_v45 = vpop.f32.mrf.mxu0  ;;  %v1345_v52 = vpop.f32.mrf.mxu1 }
 0x1a5   : > { %2371 = vst [vmem:[%s3485_s9 + $0x548] sm:$0xff] %v2115_v36  ;;  %2373 = vst [vmem:[%s3485_s9 + $0x558] sm:$0xff] %v2117_v38  ;;  %v1875_v20 = vmax.f32 %v1181_v39, 0.0  ;;  %v1877_v31 = vmax.f32 %v1342_v41, 0.0  ;;  %v1185_v40 = vadd.f32 %v1184_v45, %v3645_v55  ;;  %v1346_v47 = vadd.f32 %v1345_v52, %v3645_v55 }
 0x1a6   : > { %v2130_v57 = vmin.f32 %v1874_v42, 6.0  ;;  %v2132_v50 = vmin.f32 %v1876_v44, 6.0  ;;  %v1186_v58 = vpop.f32.mrf.mxu0  ;;  %v1347_v59 = vpop.f32.mrf.mxu1 }
 0x1a7   : > { %v2131_v60 = vmin.f32 %v1875_v20, 6.0  ;;  %v2133_v61 = vmin.f32 %v1877_v31, 6.0  ;;  %v1890_v62 = vmax.f32 %v1185_v40, 0.0  ;;  %v1892_v63 = vmax.f32 %v1346_v47, 0.0 }
 0x1a8   : > { %2386 = vst [vmem:[%s3485_s9 + $0x5c0] sm:$0xff] %v2130_v57  ;;  %2388 = vst [vmem:[%s3485_s9 + $0x5d0] sm:$0xff] %v2132_v50  ;;  %v1187_v1 = vadd.f32 %v1186_v58, %v3645_v55  ;;  %v1348_v0 = vadd.f32 %v1347_v59, %v3645_v55  ;;  %v1190_v2 = vpop.f32.mrf.mxu0  ;;  %v1351_v4 = vpop.f32.mrf.mxu1 }
 0x1a9   : > { %2387 = vst [vmem:[%s3485_s9 + $0x5c8] sm:$0xff] %v2131_v60  ;;  %2389 = vst [vmem:[%s3485_s9 + $0x5d8] sm:$0xff] %v2133_v61  ;;  %v2146_v5 = vmin.f32 %v1890_v62, 6.0  ;;  %v2148_v6 = vmin.f32 %v1892_v63, 6.0  ;;  %v1191_v7 = vadd.f32 %v1190_v2, %v3665_v18  ;;  %v1352_v8 = vadd.f32 %v1351_v4, %v3665_v18 }
 0x1aa   : > { %v1891_v9 = vmax.f32 %v1187_v1, 0.0  ;;  %v1893_v25 = vmax.f32 %v1348_v0, 0.0  ;;  %v1192_v34 = vpop.f32.mrf.mxu0  ;;  %v1353_v43 = vpop.f32.mrf.mxu1 }
 0x1ab   : > { %2402 = vst [vmem:[%s3485_s9 + $0x640] sm:$0xff] %v2146_v5  ;;  %2404 = vst [vmem:[%s3485_s9 + $0x650] sm:$0xff] %v2148_v6  ;;  %v1906_v48 = vmax.f32 %v1191_v7, 0.0  ;;  %v1908_v11 = vmax.f32 %v1352_v8, 0.0  ;;  %v1193_v12 = vadd.f32 %v1192_v34, %v3665_v18  ;;  %v1354_v19 = vadd.f32 %v1353_v43, %v3665_v18 }
 0x1ac   : > { %v2147_v21 = vmin.f32 %v1891_v9, 6.0  ;;  %v2149_v22 = vmin.f32 %v1893_v25, 6.0  ;;  %v1196_v23 = vpop.f32.mrf.mxu0  ;;  %v1357_v24 = vpop.f32.mrf.mxu1 }
 0x1ad   : > { %v2162_v27 = vmin.f32 %v1906_v48, 6.0  ;;  %v2164_v15 = vmin.f32 %v1908_v11, 6.0  ;;  %v1907_v30 = vmax.f32 %v1193_v12, 0.0  ;;  %v1909_v32 = vmax.f32 %v1354_v19, 0.0 }
 0x1ae   : > { %2403 = vst [vmem:[%s3485_s9 + $0x648] sm:$0xff] %v2147_v21  ;;  %2405 = vst [vmem:[%s3485_s9 + $0x658] sm:$0xff] %v2149_v22  ;;  %v1197_v46 = vadd.f32 %v1196_v23, %v3673_v37  ;;  %v1358_v33 = vadd.f32 %v1357_v24, %v3673_v37  ;;  %v1198_v49 = vpop.f32.mrf.mxu0  ;;  %v1359_v35 = vpop.f32.mrf.mxu1 }
 0x1af   : > { %2418 = vst [vmem:[%s3485_s9 + $0x6c0] sm:$0xff] %v2162_v27  ;;  %2420 = vst [vmem:[%s3485_s9 + $0x6d0] sm:$0xff] %v2164_v15  ;;  %v2163_v36 = vmin.f32 %v1907_v30, 6.0  ;;  %v2165_v38 = vmin.f32 %v1909_v32, 6.0  ;;  %v1199_v39 = vadd.f32 %v1198_v49, %v3673_v37  ;;  %v1360_v41 = vadd.f32 %v1359_v35, %v3673_v37 }
 0x1b0   : > { %v1922_v42 = vmax.f32 %v1197_v46, 0.0  ;;  %v1924_v44 = vmax.f32 %v1358_v33, 0.0  ;;  %v1202_v45 = vpop.f32.mrf.mxu0  ;;  %v1363_v52 = vpop.f32.mrf.mxu1 }
 0x1b1   : > { %2419 = vst [vmem:[%s3485_s9 + $0x6c8] sm:$0xff] %v2163_v36  ;;  %2421 = vst [vmem:[%s3485_s9 + $0x6d8] sm:$0xff] %v2165_v38  ;;  %v1923_v20 = vmax.f32 %v1199_v39, 0.0  ;;  %v1925_v31 = vmax.f32 %v1360_v41, 0.0  ;;  %v1203_v40 = vadd.f32 %v1202_v45, %v3693_v56  ;;  %v1364_v47 = vadd.f32 %v1363_v52, %v3693_v56 }
 0x1b2   : > { %v2178_v57 = vmin.f32 %v1922_v42, 6.0  ;;  %v2180_v50 = vmin.f32 %v1924_v44, 6.0  ;;  %v1204_v58 = vpop.f32.mrf.mxu0  ;;  %v1365_v59 = vpop.f32.mrf.mxu1 }
 0x1b3   : > { %v2179_v60 = vmin.f32 %v1923_v20, 6.0  ;;  %v2181_v61 = vmin.f32 %v1925_v31, 6.0  ;;  %v1938_v62 = vmax.f32 %v1203_v40, 0.0  ;;  %v1940_v63 = vmax.f32 %v1364_v47, 0.0 }
 0x1b4   : > { %2434 = vst [vmem:[%s3485_s9 + $0x740] sm:$0xff] %v2178_v57  ;;  %2436 = vst [vmem:[%s3485_s9 + $0x750] sm:$0xff] %v2180_v50  ;;  %v1205_v1 = vadd.f32 %v1204_v58, %v3693_v56  ;;  %v1366_v0 = vadd.f32 %v1365_v59, %v3693_v56  ;;  %v1434_v2 = vpop.f32.mrf.mxu0  ;;  %v1595_v4 = vpop.f32.mrf.mxu1 }
 0x1b5   : > { %2435 = vst [vmem:[%s3485_s9 + $0x748] sm:$0xff] %v2179_v60  ;;  %2437 = vst [vmem:[%s3485_s9 + $0x758] sm:$0xff] %v2181_v61  ;;  %v2194_v5 = vmin.f32 %v1938_v62, 6.0  ;;  %v2196_v6 = vmin.f32 %v1940_v63, 6.0  ;;  %v1435_v7 = vadd.f32 %v1434_v2, %v3460_v3  ;;  %v1596_v8 = vadd.f32 %v1595_v4, %v3460_v3 }
 0x1b6   : > { %v1939_v9 = vmax.f32 %v1205_v1, 0.0  ;;  %v1941_v25 = vmax.f32 %v1366_v0, 0.0  ;;  %v1436_v34 = vpop.f32.mrf.mxu0  ;;  %v1597_v43 = vpop.f32.mrf.mxu1 }
 0x1b7   : > { %2450 = vst [vmem:[%s3485_s9 + $0x7c0] sm:$0xff] %v2194_v5  ;;  %2452 = vst [vmem:[%s3485_s9 + $0x7d0] sm:$0xff] %v2196_v6  ;;  %v1702_v48 = vmax.f32 %v1435_v7, 0.0  ;;  %v1704_v11 = vmax.f32 %v1596_v8, 0.0  ;;  %v1437_v12 = vadd.f32 %v1436_v34, %v3460_v3  ;;  %v1598_v19 = vadd.f32 %v1597_v43, %v3460_v3 }
 0x1b8   : > { %v2195_v21 = vmin.f32 %v1939_v9, 6.0  ;;  %v2197_v22 = vmin.f32 %v1941_v25, 6.0  ;;  %v1440_v23 = vpop.f32.mrf.mxu0  ;;  %v1601_v24 = vpop.f32.mrf.mxu1 }
 0x1b9   : > { %v1958_v27 = vmin.f32 %v1702_v48, 6.0  ;;  %v1960_v15 = vmin.f32 %v1704_v11, 6.0  ;;  %v1703_v30 = vmax.f32 %v1437_v12, 0.0  ;;  %v1705_v32 = vmax.f32 %v1598_v19, 0.0 }
 0x1ba   : > { %2451 = vst [vmem:[%s3485_s9 + $0x7c8] sm:$0xff] %v2195_v21  ;;  %2453 = vst [vmem:[%s3485_s9 + $0x7d8] sm:$0xff] %v2197_v22  ;;  %v1441_v46 = vadd.f32 %v1440_v23, %v3473_v16  ;;  %v1602_v33 = vadd.f32 %v1601_v24, %v3473_v16  ;;  %v1442_v49 = vpop.f32.mrf.mxu0  ;;  %v1603_v35 = vpop.f32.mrf.mxu1 }
 0x1bb   : > { %2214 = vst [vmem:[%s3485_s9 + $0x60] sm:$0xff] %v1958_v27  ;;  %2216 = vst [vmem:[%s3485_s9 + $0x70] sm:$0xff] %v1960_v15  ;;  %v1959_v3 = vmin.f32 %v1703_v30, 6.0  ;;  %v1961_v36 = vmin.f32 %v1705_v32, 6.0  ;;  %v1443_v38 = vadd.f32 %v1442_v49, %v3473_v16  ;;  %v1604_v39 = vadd.f32 %v1603_v35, %v3473_v16 }
 0x1bc   : > { %v1718_v41 = vmax.f32 %v1441_v46, 0.0  ;;  %v1720_v42 = vmax.f32 %v1602_v33, 0.0  ;;  %v1446_v44 = vpop.f32.mrf.mxu0  ;;  %v1607_v45 = vpop.f32.mrf.mxu1 }
 0x1bd   : > { %2215 = vst [vmem:[%s3485_s9 + $0x68] sm:$0xff] %v1959_v3  ;;  %2217 = vst [vmem:[%s3485_s9 + $0x78] sm:$0xff] %v1961_v36  ;;  %v1719_v52 = vmax.f32 %v1443_v38, 0.0  ;;  %v1721_v20 = vmax.f32 %v1604_v39, 0.0  ;;  %v1447_v31 = vadd.f32 %v1446_v44, %v3475_v10  ;;  %v1608_v40 = vadd.f32 %v1607_v45, %v3475_v10 }
 0x1be   : > { %v1974_v47 = vmin.f32 %v1718_v41, 6.0  ;;  %v1976_v57 = vmin.f32 %v1720_v42, 6.0  ;;  %v1448_v50 = vpop.f32.mrf.mxu0  ;;  %v1609_v16 = vpop.f32.mrf.mxu1 }
 0x1bf   : > { %v1975_v58 = vmin.f32 %v1719_v52, 6.0  ;;  %v1977_v59 = vmin.f32 %v1721_v20, 6.0  ;;  %v1734_v60 = vmax.f32 %v1447_v31, 0.0  ;;  %v1736_v61 = vmax.f32 %v1608_v40, 0.0 }
 0x1c0   : > { %2230 = vst [vmem:[%s3485_s9 + $0xe0] sm:$0xff] %v1974_v47  ;;  %2232 = vst [vmem:[%s3485_s9 + $0xf0] sm:$0xff] %v1976_v57  ;;  %v1449_v62 = vadd.f32 %v1448_v50, %v3475_v10  ;;  %v1610_v63 = vadd.f32 %v1609_v16, %v3475_v10  ;;  %v1452_v1 = vpop.f32.mrf.mxu0  ;;  %v1613_v0 = vpop.f32.mrf.mxu1 }
 0x1c1   : > { %2231 = vst [vmem:[%s3485_s9 + $0xe8] sm:$0xff] %v1975_v58  ;;  %2233 = vst [vmem:[%s3485_s9 + $0xf8] sm:$0xff] %v1977_v59  ;;  %v1990_v2 = vmin.f32 %v1734_v60, 6.0  ;;  %v1992_v4 = vmin.f32 %v1736_v61, 6.0  ;;  %v1453_v5 = vadd.f32 %v1452_v1, %v3501_v51  ;;  %v1614_v6 = vadd.f32 %v1613_v0, %v3501_v51 }
 0x1c2   : > { %v1735_v7 = vmax.f32 %v1449_v62, 0.0  ;;  %v1737_v8 = vmax.f32 %v1610_v63, 0.0  ;;  %v1454_v9 = vpop.f32.mrf.mxu0  ;;  %v1615_v25 = vpop.f32.mrf.mxu1 }
 0x1c3   : > { %2246 = vst [vmem:[%s3485_s9 + $0x160] sm:$0xff] %v1990_v2  ;;  %2248 = vst [vmem:[%s3485_s9 + $0x170] sm:$0xff] %v1992_v4  ;;  %v1750_v34 = vmax.f32 %v1453_v5, 0.0  ;;  %v1752_v10 = vmax.f32 %v1614_v6, 0.0  ;;  %v1455_v43 = vadd.f32 %v1454_v9, %v3501_v51  ;;  %v1616_v48 = vadd.f32 %v1615_v25, %v3501_v51 }
 0x1c4   : > { %v1991_v11 = vmin.f32 %v1735_v7, 6.0  ;;  %v1993_v12 = vmin.f32 %v1737_v8, 6.0  ;;  %v1458_v19 = vpop.f32.mrf.mxu0  ;;  %v1619_v21 = vpop.f32.mrf.mxu1 }
 0x1c5   : > { %v2006_v22 = vmin.f32 %v1750_v34, 6.0  ;;  %v2008_v23 = vmin.f32 %v1752_v10, 6.0  ;;  %v1751_v24 = vmax.f32 %v1455_v43, 0.0  ;;  %v1753_v27 = vmax.f32 %v1616_v48, 0.0 }
 0x1c6   : > { %2247 = vst [vmem:[%s3485_s9 + $0x168] sm:$0xff] %v1991_v11  ;;  %2249 = vst [vmem:[%s3485_s9 + $0x178] sm:$0xff] %v1993_v12  ;;  %v1459_v15 = vadd.f32 %v1458_v19, %v3521_v13  ;;  %v1620_v30 = vadd.f32 %v1619_v21, %v3521_v13  ;;  %v1460_v32 = vpop.f32.mrf.mxu0  ;;  %v1621_v46 = vpop.f32.mrf.mxu1 }
 0x1c7   : > { %2262 = vst [vmem:[%s3485_s9 + $0x1e0] sm:$0xff] %v2006_v22  ;;  %2264 = vst [vmem:[%s3485_s9 + $0x1f0] sm:$0xff] %v2008_v23  ;;  %v2007_v51 = vmin.f32 %v1751_v24, 6.0  ;;  %v2009_v33 = vmin.f32 %v1753_v27, 6.0  ;;  %v1461_v49 = vadd.f32 %v1460_v32, %v3521_v13  ;;  %v1622_v35 = vadd.f32 %v1621_v46, %v3521_v13 }
 0x1c8   : > { %v1766_v3 = vmax.f32 %v1459_v15, 0.0  ;;  %v1768_v36 = vmax.f32 %v1620_v30, 0.0  ;;  %v1464_v38 = vpop.f32.mrf.mxu0  ;;  %v1625_v39 = vpop.f32.mrf.mxu1 }
 0x1c9   : > { %2263 = vst [vmem:[%s3485_s9 + $0x1e8] sm:$0xff] %v2007_v51  ;;  %2265 = vst [vmem:[%s3485_s9 + $0x1f8] sm:$0xff] %v2009_v33  ;;  %v1767_v41 = vmax.f32 %v1461_v49, 0.0  ;;  %v1769_v42 = vmax.f32 %v1622_v35, 0.0  ;;  %v1465_v44 = vadd.f32 %v1464_v38, %v3529_v26  ;;  %v1626_v45 = vadd.f32 %v1625_v39, %v3529_v26 }
 0x1ca   : > { %v2022_v52 = vmin.f32 %v1766_v3, 6.0  ;;  %v2024_v20 = vmin.f32 %v1768_v36, 6.0  ;;  %v1466_v31 = vpop.f32.mrf.mxu0  ;;  %v1627_v13 = vpop.f32.mrf.mxu1 }
 0x1cb   : > { %v2023_v40 = vmin.f32 %v1767_v41, 6.0  ;;  %v2025_v47 = vmin.f32 %v1769_v42, 6.0  ;;  %v1782_v57 = vmax.f32 %v1465_v44, 0.0  ;;  %v1784_v50 = vmax.f32 %v1626_v45, 0.0 }
 0x1cc   : > { %2278 = vst [vmem:[%s3485_s9 + $0x260] sm:$0xff] %v2022_v52  ;;  %2280 = vst [vmem:[%s3485_s9 + $0x270] sm:$0xff] %v2024_v20  ;;  %v1467_v16 = vadd.f32 %v1466_v31, %v3529_v26  ;;  %v1628_v58 = vadd.f32 %v1627_v13, %v3529_v26  ;;  %v1470_v59 = vpop.f32.mrf.mxu0  ;;  %v1631_v60 = vpop.f32.mrf.mxu1 }
 0x1cd   : > { %2279 = vst [vmem:[%s3485_s9 + $0x268] sm:$0xff] %v2023_v40  ;;  %2281 = vst [vmem:[%s3485_s9 + $0x278] sm:$0xff] %v2025_v47  ;;  %v2038_v61 = vmin.f32 %v1782_v57, 6.0  ;;  %v2040_v62 = vmin.f32 %v1784_v50, 6.0  ;;  %v1471_v63 = vadd.f32 %v1470_v59, %v3549_v53  ;;  %v1632_v1 = vadd.f32 %v1631_v60, %v3549_v53 }
 0x1ce   : > { %v1783_v0 = vmax.f32 %v1467_v16, 0.0  ;;  %v1785_v2 = vmax.f32 %v1628_v58, 0.0  ;;  %v1472_v4 = vpop.f32.mrf.mxu0  ;;  %v1633_v5 = vpop.f32.mrf.mxu1 }
 0x1cf   : > { %2294 = vst [vmem:[%s3485_s9 + $0x2e0] sm:$0xff] %v2038_v61  ;;  %2296 = vst [vmem:[%s3485_s9 + $0x2f0] sm:$0xff] %v2040_v62  ;;  %v1798_v6 = vmax.f32 %v1471_v63, 0.0  ;;  %v1800_v26 = vmax.f32 %v1632_v1, 0.0  ;;  %v1473_v7 = vadd.f32 %v1472_v4, %v3549_v53  ;;  %v1634_v8 = vadd.f32 %v1633_v5, %v3549_v53 }
 0x1d0   : > { %v2039_v9 = vmin.f32 %v1783_v0, 6.0  ;;  %v2041_v25 = vmin.f32 %v1785_v2, 6.0  ;;  %v1476_v34 = vpop.f32.mrf.mxu0  ;;  %v1637_v10 = vpop.f32.mrf.mxu1 }
 0x1d1   : > { %v2054_v43 = vmin.f32 %v1798_v6, 6.0  ;;  %v2056_v48 = vmin.f32 %v1800_v26, 6.0  ;;  %v1799_v11 = vmax.f32 %v1473_v7, 0.0  ;;  %v1801_v12 = vmax.f32 %v1634_v8, 0.0 }
 0x1d2   : > { %2295 = vst [vmem:[%s3485_s9 + $0x2e8] sm:$0xff] %v2039_v9  ;;  %2297 = vst [vmem:[%s3485_s9 + $0x2f8] sm:$0xff] %v2041_v25  ;;  %v1477_v19 = vadd.f32 %v1476_v34, %v3569_v14  ;;  %v1638_v21 = vadd.f32 %v1637_v10, %v3569_v14  ;;  %v1478_v22 = vpop.f32.mrf.mxu0  ;;  %v1639_v23 = vpop.f32.mrf.mxu1 }
 0x1d3   : > { %2310 = vst [vmem:[%s3485_s9 + $0x360] sm:$0xff] %v2054_v43  ;;  %2312 = vst [vmem:[%s3485_s9 + $0x370] sm:$0xff] %v2056_v48  ;;  %v2055_v53 = vmin.f32 %v1799_v11, 6.0  ;;  %v2057_v24 = vmin.f32 %v1801_v12, 6.0  ;;  %v1479_v27 = vadd.f32 %v1478_v22, %v3569_v14  ;;  %v1640_v15 = vadd.f32 %v1639_v23, %v3569_v14 }
 0x1d4   : > { %v1814_v30 = vmax.f32 %v1477_v19, 0.0  ;;  %v1816_v32 = vmax.f32 %v1638_v21, 0.0  ;;  %v1482_v46 = vpop.f32.mrf.mxu0  ;;  %v1643_v51 = vpop.f32.mrf.mxu1 }
 0x1d5   : > { %2311 = vst [vmem:[%s3485_s9 + $0x368] sm:$0xff] %v2055_v53  ;;  %2313 = vst [vmem:[%s3485_s9 + $0x378] sm:$0xff] %v2057_v24  ;;  %v1815_v33 = vmax.f32 %v1479_v27, 0.0  ;;  %v1817_v49 = vmax.f32 %v1640_v15, 0.0  ;;  %v1483_v35 = vadd.f32 %v1482_v46, %v3577_v29  ;;  %v1644_v3 = vadd.f32 %v1643_v51, %v3577_v29 }
 0x1d6   : > { %v2070_v36 = vmin.f32 %v1814_v30, 6.0  ;;  %v2072_v38 = vmin.f32 %v1816_v32, 6.0  ;;  %v1484_v39 = vpop.f32.mrf.mxu0  ;;  %v1645_v14 = vpop.f32.mrf.mxu1 }
 0x1d7   : > { %v2071_v41 = vmin.f32 %v1815_v33, 6.0  ;;  %v2073_v42 = vmin.f32 %v1817_v49, 6.0  ;;  %v1830_v44 = vmax.f32 %v1483_v35, 0.0  ;;  %v1832_v45 = vmax.f32 %v1644_v3, 0.0 }
 0x1d8   : > { %2326 = vst [vmem:[%s3485_s9 + $0x3e0] sm:$0xff] %v2070_v36  ;;  %2328 = vst [vmem:[%s3485_s9 + $0x3f0] sm:$0xff] %v2072_v38  ;;  %v1485_v52 = vadd.f32 %v1484_v39, %v3577_v29  ;;  %v1646_v20 = vadd.f32 %v1645_v14, %v3577_v29  ;;  %v1488_v31 = vpop.f32.mrf.mxu0  ;;  %v1649_v13 = vpop.f32.mrf.mxu1 }
 0x1d9   : > { %2327 = vst [vmem:[%s3485_s9 + $0x3e8] sm:$0xff] %v2071_v41  ;;  %2329 = vst [vmem:[%s3485_s9 + $0x3f8] sm:$0xff] %v2073_v42  ;;  %v2086_v40 = vmin.f32 %v1830_v44, 6.0  ;;  %v2088_v47 = vmin.f32 %v1832_v45, 6.0  ;;  %v1489_v57 = vadd.f32 %v1488_v31, %v3597_v54  ;;  %v1650_v50 = vadd.f32 %v1649_v13, %v3597_v54 }
 0x1da   : > { %v1831_v16 = vmax.f32 %v1485_v52, 0.0  ;;  %v1833_v58 = vmax.f32 %v1646_v20, 0.0  ;;  %v1490_v59 = vpop.f32.mrf.mxu0  ;;  %v1651_v60 = vpop.f32.mrf.mxu1 }
 0x1db   : > { %2342 = vst [vmem:[%s3485_s9 + $0x460] sm:$0xff] %v2086_v40  ;;  %2344 = vst [vmem:[%s3485_s9 + $0x470] sm:$0xff] %v2088_v47  ;;  %v1846_v61 = vmax.f32 %v1489_v57, 0.0  ;;  %v1848_v29 = vmax.f32 %v1650_v50, 0.0  ;;  %v1491_v62 = vadd.f32 %v1490_v59, %v3597_v54  ;;  %v1652_v63 = vadd.f32 %v1651_v60, %v3597_v54 }
 0x1dc   : > { %v2087_v1 = vmin.f32 %v1831_v16, 6.0  ;;  %v2089_v0 = vmin.f32 %v1833_v58, 6.0  ;;  %v1494_v2 = vpop.f32.mrf.mxu0  ;;  %v1655_v4 = vpop.f32.mrf.mxu1 }
 0x1dd   : > { %v2102_v5 = vmin.f32 %v1846_v61, 6.0  ;;  %v2104_v6 = vmin.f32 %v1848_v29, 6.0  ;;  %v1847_v26 = vmax.f32 %v1491_v62, 0.0  ;;  %v1849_v7 = vmax.f32 %v1652_v63, 0.0 }
 0x1de   : > { %2343 = vst [vmem:[%s3485_s9 + $0x468] sm:$0xff] %v2087_v1  ;;  %2345 = vst [vmem:[%s3485_s9 + $0x478] sm:$0xff] %v2089_v0  ;;  %v1495_v8 = vadd.f32 %v1494_v2, %v3617_v17  ;;  %v1656_v9 = vadd.f32 %v1655_v4, %v3617_v17  ;;  %v1496_v25 = vpop.f32.mrf.mxu0  ;;  %v1657_v34 = vpop.f32.mrf.mxu1 }
 0x1df   : > { %2358 = vst [vmem:[%s3485_s9 + $0x4e0] sm:$0xff] %v2102_v5  ;;  %2360 = vst [vmem:[%s3485_s9 + $0x4f0] sm:$0xff] %v2104_v6  ;;  %v2103_v54 = vmin.f32 %v1847_v26, 6.0  ;;  %v2105_v10 = vmin.f32 %v1849_v7, 6.0  ;;  %v1497_v43 = vadd.f32 %v1496_v25, %v3617_v17  ;;  %v1658_v48 = vadd.f32 %v1657_v34, %v3617_v17 }
 0x1e0   : > { %v1862_v11 = vmax.f32 %v1495_v8, 0.0  ;;  %v1864_v12 = vmax.f32 %v1656_v9, 0.0  ;;  %v1500_v19 = vpop.f32.mrf.mxu0  ;;  %v1661_v21 = vpop.f32.mrf.mxu1 }
 0x1e1   : > { %2359 = vst [vmem:[%s3485_s9 + $0x4e8] sm:$0xff] %v2103_v54  ;;  %2361 = vst [vmem:[%s3485_s9 + $0x4f8] sm:$0xff] %v2105_v10  ;;  %v1863_v22 = vmax.f32 %v1497_v43, 0.0  ;;  %v1865_v23 = vmax.f32 %v1658_v48, 0.0  ;;  %v1501_v53 = vadd.f32 %v1500_v19, %v3625_v28  ;;  %v1662_v24 = vadd.f32 %v1661_v21, %v3625_v28 }
 0x1e2   : > { %v2118_v27 = vmin.f32 %v1862_v11, 6.0  ;;  %v2120_v15 = vmin.f32 %v1864_v12, 6.0  ;;  %v1502_v30 = vpop.f32.mrf.mxu0  ;;  %v1663_v17 = vpop.f32.mrf.mxu1 }
 0x1e3   : > { %v2119_v32 = vmin.f32 %v1863_v22, 6.0  ;;  %v2121_v46 = vmin.f32 %v1865_v23, 6.0  ;;  %v1878_v51 = vmax.f32 %v1501_v53, 0.0  ;;  %v1880_v33 = vmax.f32 %v1662_v24, 0.0 }
 0x1e4   : > { %2374 = vst [vmem:[%s3485_s9 + $0x560] sm:$0xff] %v2118_v27  ;;  %2376 = vst [vmem:[%s3485_s9 + $0x570] sm:$0xff] %v2120_v15  ;;  %v1503_v49 = vadd.f32 %v1502_v30, %v3625_v28  ;;  %v1664_v35 = vadd.f32 %v1663_v17, %v3625_v28  ;;  %v1506_v3 = vpop.f32.mrf.mxu0  ;;  %v1667_v36 = vpop.f32.mrf.mxu1 }
 0x1e5   : > { %2375 = vst [vmem:[%s3485_s9 + $0x568] sm:$0xff] %v2119_v32  ;;  %2377 = vst [vmem:[%s3485_s9 + $0x578] sm:$0xff] %v2121_v46  ;;  %v2134_v38 = vmin.f32 %v1878_v51, 6.0  ;;  %v2136_v39 = vmin.f32 %v1880_v33, 6.0  ;;  %v1507_v14 = vadd.f32 %v1506_v3, %v3645_v55  ;;  %v1668_v41 = vadd.f32 %v1667_v36, %v3645_v55 }
 0x1e6   : > { %v1879_v42 = vmax.f32 %v1503_v49, 0.0  ;;  %v1881_v44 = vmax.f32 %v1664_v35, 0.0  ;;  %v1508_v45 = vpop.f32.mrf.mxu0  ;;  %v1669_v52 = vpop.f32.mrf.mxu1 }
 0x1e7   : > { %2390 = vst [vmem:[%s3485_s9 + $0x5e0] sm:$0xff] %v2134_v38  ;;  %2392 = vst [vmem:[%s3485_s9 + $0x5f0] sm:$0xff] %v2136_v39  ;;  %v1894_v20 = vmax.f32 %v1507_v14, 0.0  ;;  %v1896_v28 = vmax.f32 %v1668_v41, 0.0  ;;  %v1509_v31 = vadd.f32 %v1508_v45, %v3645_v55  ;;  %v1670_v13 = vadd.f32 %v1669_v52, %v3645_v55 }
 0x1e8   : > { %v2135_v40 = vmin.f32 %v1879_v42, 6.0  ;;  %v2137_v47 = vmin.f32 %v1881_v44, 6.0  ;;  %v1512_v57 = vpop.f32.mrf.mxu0  ;;  %v1673_v50 = vpop.f32.mrf.mxu1 }
 0x1e9   : > { %v2150_v16 = vmin.f32 %v1894_v20, 6.0  ;;  %v2152_v58 = vmin.f32 %v1896_v28, 6.0  ;;  %v1895_v59 = vmax.f32 %v1509_v31, 0.0  ;;  %v1897_v60 = vmax.f32 %v1670_v13, 0.0 }
 0x1ea   : > { %2391 = vst [vmem:[%s3485_s9 + $0x5e8] sm:$0xff] %v2135_v40  ;;  %2393 = vst [vmem:[%s3485_s9 + $0x5f8] sm:$0xff] %v2137_v47  ;;  %v1513_v61 = vadd.f32 %v1512_v57, %v3665_v18  ;;  %v1674_v29 = vadd.f32 %v1673_v50, %v3665_v18  ;;  %v1514_v62 = vpop.f32.mrf.mxu0  ;;  %v1675_v63 = vpop.f32.mrf.mxu1 }
 0x1eb   : > { %2406 = vst [vmem:[%s3485_s9 + $0x660] sm:$0xff] %v2150_v16  ;;  %2408 = vst [vmem:[%s3485_s9 + $0x670] sm:$0xff] %v2152_v58  ;;  %v2151_v55 = vmin.f32 %v1895_v59, 6.0  ;;  %v2153_v1 = vmin.f32 %v1897_v60, 6.0  ;;  %v1515_v0 = vadd.f32 %v1514_v62, %v3665_v18  ;;  %v1676_v2 = vadd.f32 %v1675_v63, %v3665_v18 }
 0x1ec   : > { %v1910_v4 = vmax.f32 %v1513_v61, 0.0  ;;  %v1912_v5 = vmax.f32 %v1674_v29, 0.0  ;;  %v1518_v6 = vpop.f32.mrf.mxu0  ;;  %v1679_v26 = vpop.f32.mrf.mxu1 }
 0x1ed   : > { %2407 = vst [vmem:[%s3485_s9 + $0x668] sm:$0xff] %v2151_v55  ;;  %2409 = vst [vmem:[%s3485_s9 + $0x678] sm:$0xff] %v2153_v1  ;;  %v1911_v7 = vmax.f32 %v1515_v0, 0.0  ;;  %v1913_v8 = vmax.f32 %v1676_v2, 0.0  ;;  %v1519_v9 = vadd.f32 %v1518_v6, %v3673_v37  ;;  %v1680_v25 = vadd.f32 %v1679_v26, %v3673_v37 }
 0x1ee   : > { %v2166_v34 = vmin.f32 %v1910_v4, 6.0  ;;  %v2168_v54 = vmin.f32 %v1912_v5, 6.0  ;;  %v1520_v10 = vpop.f32.mrf.mxu0  ;;  %v1681_v18 = vpop.f32.mrf.mxu1 }
 0x1ef   : > { %v2167_v43 = vmin.f32 %v1911_v7, 6.0  ;;  %v2169_v48 = vmin.f32 %v1913_v8, 6.0  ;;  %v1926_v11 = vmax.f32 %v1519_v9, 0.0  ;;  %v1928_v12 = vmax.f32 %v1680_v25, 0.0 }
 0x1f0   : > { %2422 = vst [vmem:[%s3485_s9 + $0x6e0] sm:$0xff] %v2166_v34  ;;  %2424 = vst [vmem:[%s3485_s9 + $0x6f0] sm:$0xff] %v2168_v54  ;;  %v1521_v19 = vadd.f32 %v1520_v10, %v3673_v37  ;;  %v1682_v21 = vadd.f32 %v1681_v18, %v3673_v37  ;;  %v1524_v22 = vpop.f32.mrf.mxu0  ;;  %v1685_v23 = vpop.f32.mrf.mxu1 }
 0x1f1   : > { %2423 = vst [vmem:[%s3485_s9 + $0x6e8] sm:$0xff] %v2167_v43  ;;  %2425 = vst [vmem:[%s3485_s9 + $0x6f8] sm:$0xff] %v2169_v48  ;;  %v2182_v53 = vmin.f32 %v1926_v11, 6.0  ;;  %v2184_v24 = vmin.f32 %v1928_v12, 6.0  ;;  %v1525_v27 = vadd.f32 %v1524_v22, %v3693_v56  ;;  %v1686_v15 = vadd.f32 %v1685_v23, %v3693_v56 }
 0x1f2   : > { %v1927_v30 = vmax.f32 %v1521_v19, 0.0  ;;  %v1929_v17 = vmax.f32 %v1682_v21, 0.0  ;;  %v1526_v32 = vpop.f32.mrf.mxu0  ;;  %v1687_v46 = vpop.f32.mrf.mxu1 }
 0x1f3   : > { %2438 = vst [vmem:[%s3485_s9 + $0x760] sm:$0xff] %v2182_v53  ;;  %2440 = vst [vmem:[%s3485_s9 + $0x770] sm:$0xff] %v2184_v24  ;;  %v1942_v37 = vmax.f32 %v1525_v27, 0.0  ;;  %v1944_v51 = vmax.f32 %v1686_v15, 0.0  ;;  %v1527_v33 = vadd.f32 %v1526_v32, %v3693_v56  ;;  %v1688_v49 = vadd.f32 %v1687_v46, %v3693_v56 }
 0x1f4   : > { %v2183_v35 = vmin.f32 %v1927_v30, 6.0  ;;  %v2185_v3 = vmin.f32 %v1929_v17, 6.0 }
 0x1f5   : > { %v2198_v36 = vmin.f32 %v1942_v37, 6.0  ;;  %v2200_v38 = vmin.f32 %v1944_v51, 6.0  ;;  %v1943_v39 = vmax.f32 %v1527_v33, 0.0  ;;  %v1945_v14 = vmax.f32 %v1688_v49, 0.0 }
 0x1f6   : > { %2439 = vst [vmem:[%s3485_s9 + $0x768] sm:$0xff] %v2183_v35  ;;  %2441 = vst [vmem:[%s3485_s9 + $0x778] sm:$0xff] %v2185_v3 }
 0x1f7   : > { %2454 = vst [vmem:[%s3485_s9 + $0x7e0] sm:$0xff] %v2198_v36  ;;  %2456 = vst [vmem:[%s3485_s9 + $0x7f0] sm:$0xff] %v2200_v38  ;;  %v2199_v56 = vmin.f32 %v1943_v39, 6.0  ;;  %v2201_v41 = vmin.f32 %v1945_v14, 6.0 }
 0x1f9   : > { %2455 = vst [vmem:[%s3485_s9 + $0x7e8] sm:$0xff] %v2199_v56  ;;  %2457 = vst [vmem:[%s3485_s9 + $0x7f8] sm:$0xff] %v2201_v41 }
 0x1fa   : > { %2820 = shalt.err (!%p2817_p6)
}
 0x1fb   : > { %s2821_s6 = scalar_lea.hbm %s4101_s22, 32768  ;;  %s2825_s5 = scalar_lea.hbm %s4159_s3, 262144 }
 0x1fc   : > { %p2822_p7 = scmp.ne.s32.totalorder %s4101_s22, %s2821_s6  ;;  %p2826_p12 = scmp.lt.s32.totalorder %s4101_s22, %s4159_s3 }
 0x1fd   : > { %p2827_p0 = scmp.lt.s32.totalorder %s2825_s5, %s2821_s6 }
 0x1fe   : > { %p2823_p10 = pnand %p2822_p7, %p2970_p9 }
 0x1ff   : > { %p2828_p8 = por %p2827_p0, %p2826_p12 }
 0x200   : > { %p2824_p4 = pneg %p2823_p10 }
 0x202   : > { %p2829_p13 = pnand %p2828_p8, %p2824_p4 }
 0x204   : > { %2832 = shalt.err (!%p2829_p13)
}
 0x205   : > { %s2896_s11 = smov 2048   ;;  %s2897_s18 = smov 16384  }
 0x206   : > { %s2898_s15 = smov 128  }
 0x207   : > { %2708 = dma.vmem_to_hbm [thread:$0]  (%p2970_p9), %s4105_s19, 32768, %s4101_s22, %s2459_s23, %s2896_s11, %s2897_s18, %s2898_s15  }
 0x208 PF: > { %p2719_p1 = scmp.ge.s32.totalorder %s2887_s17, 2  ;;  %s2489_s21 = sand.u32 1, %s2867_s12  }
 0x209   : > { %s2490_s28 = scalar_lea.sflag [#allocation4], %s2489_s21 }
 0x20a   : > { %p2715_p2 = pnand %p2719_p1, %p2977_p11 }
 0x20c   : > { %p2716_p3 = pneg %p2715_p2 }
 0x20e   : > { %2862 = dma.done.wait (%p2716_p3), %s2490_s28, 32768  }
 0x20f   : > { %2864 = vsyncadd (%p2716_p3), %s2490_s28, 4294934528  ;;  %s19_s17 = sadd.s32 1, %s2887_s17   ;;  %s4165_s12 = smov %s2871_s13 }
 0x210   : > { %p16_p5 = scmp.ge.s32.totalorder %s19_s17, 10   ;;  %s4166_s13 = smov %s2875_s14 }
 0x211   : > { %s4167_s14 = smov %s2975_s26  ;;  %s4168_s15 = smov %s2883_s16 }
 0x212   : > { %s4169_s16 = smov %s4171_s20  ;;  %18 = sbr.rel (!%p16_p5) target bundleno = 6 (0x6), region = 77 }
 0x217   :  { %2495 = vsyncpa [#allocation3], 1 }
 0x218   :  { %2497 = vsyncpa [#allocation3 + $0x1], 1 }
 0x219   :  { %2498 = vsyncpa [#allocation4], 1 }
 0x21a   :  { %2500 = vsyncpa [#allocation4 + $0x1], 1 }

</bundles_post_ra>
